<compile_context>
chip_gen: v7x
topology: tpu7x:2x2x1
jax: 0.10.0
libtpu: 0.0.40
codegen_flags: <defaults>
</compile_context>

<pallas_src>
import numpy as np

import jax
import jax.numpy as jnp
from jax.experimental import pallas as pl
from jax.experimental.pallas import tpu as pltpu

# ----------------------------- model config ----------------------------------
VOCAB = 64
HIDDEN = 32
N_HEADS = 4
HEAD_DIM = HIDDEN // N_HEADS            # 8
N_LAYERS = 2
INTER = 64
PAST_SEQ = 8
BATCH = 1
RMS_EPS = 1e-5
ROPE_THETA = 10000.0
MAX_POS = 32                            # RoPE table capacity (>= PAST_SEQ + 1)
S_TOT = PAST_SEQ + 1                    # past rows + the new token row

# --------------------------- packed slab layouts ------------------------------
# bf16 weight slab (width W_COLS): per layer  wqkv5 | wo | wgu | wd,  then
# lm_head, then the tiny 0/1 head-selector matrices hsum / hexp.
W_COLS = 5 * HIDDEN                                     # widest = fused q|k|v|qR|kR
QKV_ROWS, WO_ROWS, WGU_ROWS, WD_ROWS = HIDDEN, HIDDEN, HIDDEN, INTER
LAYER_ROWS = QKV_ROWS + WO_ROWS + WGU_ROWS + WD_ROWS    # 160 rows / layer (16-aligned)
LMHEAD_OFF = N_LAYERS * LAYER_ROWS
HSUM_OFF = LMHEAD_OFF + HIDDEN
HEXP_OFF = HSUM_OFF + HIDDEN
W_ROWS = HEXP_OFF + N_HEADS                             # 388

# f32 constant slab (width HIDDEN): embedding table, interleaved RoPE table
# (row 2p = cos(p), row 2p+1 = sin(p), head-tiled), RMSNorm weight rows.
EMBED_OFF = 0
ROPE_OFF = EMBED_OFF + VOCAB
NORM_OFF = ROPE_OFF + 2 * MAX_POS
NORM_ROWS = 8                                           # attn0,mlp0,attn1,mlp1,final,pad
C_ROWS = NORM_OFF + NORM_ROWS                           # 136

# f32 KV slab (width HIDDEN, flat head-major): layer l K rows, then V rows.
KV_ROWS = 2 * N_LAYERS * PAST_SEQ                       # 32


# --------------------------- constant helper tables ---------------------------
def _rope_rotation_matrix():
    """R with (x @ R) == rotate_half(x) per head in the flat head-major layout."""
    half = HEAD_DIM // 2
    r = np.zeros((HIDDEN, HIDDEN), np.float32)
    for h in range(N_HEADS):
        b = h * HEAD_DIM
        for j in range(half):
            r[b + j + half, b + j] = -1.0               # out[j]      = -x[j + half]
            r[b + j, b + j + half] = 1.0                # out[j+half] =  x[j]
    return r


def _head_sum_matrix():
    """M[H, NH]: (x * y) @ M gives per-head dot products of flat vectors."""
    m = np.zeros((HIDDEN, N_HEADS), np.float32)
    for h in range(N_HEADS):
        m[h * HEAD_DIM:(h + 1) * HEAD_DIM, h] = 1.0
    return m


def _rope_table_interleaved():
    """[2*MAX_POS, HIDDEN]: row 2p = cos(p), row 2p+1 = sin(p), tiled over heads."""
    half = HEAD_DIM // 2
    inv_freq = 1.0 / (ROPE_THETA ** (np.arange(half, dtype=np.float64) * 2.0 / HEAD_DIM))
    ang = np.arange(MAX_POS, dtype=np.float64)[:, None] * inv_freq[None, :]
    cos_h = np.concatenate([np.cos(ang), np.cos(ang)], axis=1)       # [P, D]
    sin_h = np.concatenate([np.sin(ang), np.sin(ang)], axis=1)
    cos_f = np.tile(cos_h, (1, N_HEADS))                             # [P, H]
    sin_f = np.tile(sin_h, (1, N_HEADS))
    tab = np.empty((2 * MAX_POS, HIDDEN), np.float32)
    tab[0::2] = cos_f
    tab[1::2] = sin_f
    return tab


# --------------------------------- fused kernel -------------------------------
def _decode_step_kernel(scalars_ref, c_ref, w_ref, kv_ref,
                        tok_ref, kvnew_ref, k_sc, v_sc):
    """Whole decode step (all layers + lm_head + argmax) in one kernel."""
    tok = scalars_ref[0]                                # token id   (SMEM scalar)
    pos = scalars_ref[1]                                # RoPE position

    # Embedding row + RoPE cos/sin rows gathered with dynamic sublane slices.
    x = c_ref[pl.ds(EMBED_OFF + tok, 1), :]             # [1, H] f32
    cos = c_ref[pl.ds(ROPE_OFF + 2 * pos, 1), :]        # [1, H] head-tiled
    sin = c_ref[pl.ds(ROPE_OFF + 2 * pos + 1, 1), :]

    # Tiny 0/1 selector matrices (exact in bf16) for per-head reductions.
    hsum = w_ref[HSUM_OFF:HSUM_OFF + HIDDEN, 0:N_HEADS]      # [H, NH]
    hexp = w_ref[HEXP_OFF:HEXP_OFF + N_HEADS, 0:HIDDEN]      # [NH, H]

    scale = 1.0 / float(HEAD_DIM) ** 0.5

    def rmsnorm(v, norm_row):
        var = jnp.mean(v * v, axis=-1, keepdims=True)
        return v * jax.lax.rsqrt(var + RMS_EPS) * norm_row

    def wdot(a, r0, rows, cols):
        # Activations explicitly cast to bf16 (what DEFAULT MXU precision does
        # anyway); bf16 weights streamed from the packed slab; f32 accumulation.
        return jnp.dot(a.astype(jnp.bfloat16), w_ref[r0:r0 + rows, 0:cols],
                       preferred_element_type=jnp.float32)

    for l in range(N_LAYERS):
        base = l * LAYER_ROWS
        anorm = c_ref[NORM_OFF + 2 * l:NORM_OFF + 2 * l + 1, :]
        mnorm = c_ref[NORM_OFF + 2 * l + 1:NORM_OFF + 2 * l + 2, :]

        # ------------------------------ attention ------------------------------
        h = rmsnorm(x, anorm)
        # Fused projection (q | k | v | q@R | k@R): rotate_half is folded into
        # the weight, so RoPE needs no in-kernel permutation matmul.
        qkv = wdot(h, base, QKV_ROWS, 5 * HIDDEN)            # [1, 5H]
        q = qkv[:, 0:HIDDEN]
        k = qkv[:, HIDDEN:2 * HIDDEN]
        v = qkv[:, 2 * HIDDEN:3 * HIDDEN]
        qr = qkv[:, 3 * HIDDEN:4 * HIDDEN]
        kr = qkv[:, 4 * HIDDEN:5 * HIDDEN]
        q = q * cos + qr * sin
        k = k * cos + kr * sin

        # New cache slices (post-RoPE K, raw V) -> packed output slab.
        kvnew_ref[2 * l:2 * l + 1, :] = k
        kvnew_ref[2 * l + 1:2 * l + 2, :] = v

        # Merge past + new K/V: write the fresh row into row PAST_SEQ of a VMEM
        # scratch so scores / softmax / expand / value-combine are each a
        # single pass over S_TOT rows (no split past/new matmul pairs).
        k_off = 2 * l * PAST_SEQ
        v_off = k_off + PAST_SEQ
        k_sc[0:PAST_SEQ, :] = kv_ref[k_off:k_off + PAST_SEQ, :]
        k_sc[PAST_SEQ:S_TOT, :] = k
        v_sc[0:PAST_SEQ, :] = kv_ref[v_off:v_off + PAST_SEQ, :]
        v_sc[PAST_SEQ:S_TOT, :] = v
        ka = k_sc[...]                                       # [S_TOT, H]
        va = v_sc[...]

        qs = q * scale                                       # fold 1/sqrt(D) into q once
        s = jnp.dot((ka * qs).astype(jnp.bfloat16), hsum,
                    preferred_element_type=jnp.float32)      # [S_TOT, NH] scores
        m = jnp.max(s, axis=0, keepdims=True)                # [1, NH]
        p = jnp.exp(s - m)                                   # [S_TOT, NH]
        inv = pl.reciprocal(jnp.sum(p, axis=0, keepdims=True), approx=True)
        pe = jnp.dot((p * inv).astype(jnp.bfloat16), hexp,
                     preferred_element_type=jnp.float32)     # [S_TOT, H]
        ctx = jnp.sum(pe * va, axis=0, keepdims=True)        # [1, H]

        x = x + wdot(ctx, base + QKV_ROWS, WO_ROWS, HIDDEN)

        # ---------------------------- MLP (SwiGLU) -----------------------------
        h2 = rmsnorm(x, mnorm)
        gu = wdot(h2, base + QKV_ROWS + WO_ROWS, WGU_ROWS, 2 * INTER)   # [1, 2I]
        g = gu[:, 0:INTER]
        u = gu[:, INTER:2 * INTER]
        a = g * jax.nn.sigmoid(g) * u                        # SiLU: single logistic (EUP)
        x = x + wdot(a, base + QKV_ROWS + WO_ROWS + WGU_ROWS, WD_ROWS, HIDDEN)

    # --------------- final norm + lm_head + fused argmax ----------------------
    xf = rmsnorm(x, c_ref[NORM_OFF + 4:NORM_OFF + 5, :])
    logits = wdot(xf, LMHEAD_OFF, HIDDEN, VOCAB)             # [1, VOCAB], never hits HBM
    idx = jax.lax.broadcasted_iota(jnp.int32, logits.shape, 1).astype(jnp.float32)
    mx = jnp.max(logits, axis=-1, keepdims=True)
    first_max = jnp.min(jnp.where(logits >= mx, idx, float(VOCAB)),
                        axis=-1, keepdims=True)              # first maximal index
    tok_ref[...] = first_max.astype(jnp.int32)               # [1, 1]


# ------------------------------ JAX-side glue ---------------------------------
def llama_decode_step(params, token0, state0_flat):
    """Pallas equivalent of InferenceModel.forward.

    token0:      [1, 1] int32
    state0_flat: 2*N_LAYERS arrays, each [1, N_HEADS, PAST_SEQ, HEAD_DIM] f32
    returns:     (token1 [1] int32, *new_kv slices, each [1, N_HEADS, 1, HEAD_DIM])
    """
    pos = state0_flat[0].shape[2]                            # static new-token position
    scalars = jnp.concatenate([token0.reshape(-1).astype(jnp.int32),
                               jnp.array([pos], dtype=jnp.int32)])

    # HF-layout cache [1, NH, S, D] -> flat head-major rows, all layers stacked
    # into ONE slab (one DMA).
    # TODO(synk): at real sizes keep the cache HBM-resident in this flat layout
    #             and update it in place (input_output_aliases + scalar-
    #             prefetched write position); the relayout here only exists
    #             because the module interface hands HF-layout tensors and
    #             expects only the new [:, :, -1:, :] slices back.
    kv_rows = []
    for l in range(N_LAYERS):
        for t in (state0_flat[2 * l], state0_flat[2 * l + 1]):
            kv_rows.append(jnp.transpose(t[0], (1, 0, 2)).reshape(PAST_SEQ, HIDDEN))
    kv_slab = jnp.concatenate(kv_rows, axis=0)               # [2*L*S, H] f32

    def full_spec(shape):
        zeros = (0,) * len(shape)
        return pl.BlockSpec(shape, lambda i, s, _z=zeros: _z)

    grid_spec = pltpu.PrefetchScalarGridSpec(
        num_scalar_prefetch=1,
        grid=(1,),
        in_specs=[full_spec((C_ROWS, HIDDEN)),               # f32 constant slab
                  full_spec((W_ROWS, W_COLS)),               # bf16 weight slab
                  full_spec((KV_ROWS, HIDDEN))],             # f32 KV slab
        out_specs=(full_spec((1, 1)),
                   full_spec((2 * N_LAYERS, HIDDEN))),
        scratch_shapes=[pltpu.VMEM((S_TOT, HIDDEN), jnp.float32),
                        pltpu.VMEM((S_TOT, HIDDEN), jnp.float32)],
    )

    tok_out, kv_new = pl.pallas_call(
        _decode_step_kernel,
        out_shape=(jax.ShapeDtypeStruct((1, 1), jnp.int32),
                   jax.ShapeDtypeStruct((2 * N_LAYERS, HIDDEN), jnp.float32)),
        grid_spec=grid_spec,
        compiler_params=pltpu.CompilerParams(dimension_semantics=("arbitrary",)),
    )(scalars, params["c_slab"], params["w_slab"], kv_slab)

    token1 = tok_out[:, 0]                                   # [1] int32
    new_state = []
    for l in range(N_LAYERS):
        new_state.append(kv_new[2 * l].reshape(1, N_HEADS, 1, HEAD_DIM))
        new_state.append(kv_new[2 * l + 1].reshape(1, N_HEADS, 1, HEAD_DIM))
    return (token1, *new_state)


decode = jax.jit(llama_decode_step)


# ------------------------------ param init ------------------------------------
def init_params(key):
    keys = jax.random.split(key, 2 + N_LAYERS)

    def normal(k, shape, scale=0.02):
        return scale * jax.random.normal(k, shape, dtype=jnp.float32)

    rot = jnp.asarray(_rope_rotation_matrix())

    def pad_cols(w):
        return jnp.pad(w, ((0, 0), (0, W_COLS - w.shape[1])))

    w_rows = []
    for l in range(N_LAYERS):
        lk = jax.random.split(keys[2 + l], 7)
        wq = normal(lk[0], (HIDDEN, HIDDEN))
        wk = normal(lk[1], (HIDDEN, HIDDEN))
        wv = normal(lk[2], (HIDDEN, HIDDEN))
        wo = normal(lk[3], (HIDDEN, HIDDEN))
        wg = normal(lk[4], (HIDDEN, INTER))
        wu = normal(lk[5], (HIDDEN, INTER))
        wd = normal(lk[6], (INTER, HIDDEN))
        # Fold rotate_half into the fused QKV weight: columns q | k | v | q@R | k@R.
        wqkv5 = jnp.concatenate([wq, wk, wv, wq @ rot, wk @ rot], axis=1)
        w_rows += [pad_cols(wqkv5), pad_cols(wo),
                   pad_cols(jnp.concatenate([wg, wu], axis=1)), pad_cols(wd)]
    w_rows.append(pad_cols(normal(keys[1], (HIDDEN, VOCAB))))          # lm_head
    hsum = _head_sum_matrix()
    w_rows.append(pad_cols(jnp.asarray(hsum)))                         # head_sum
    w_rows.append(pad_cols(jnp.asarray(hsum.T.copy())))                # head_expand
    w_slab = jnp.concatenate(w_rows, axis=0).astype(jnp.bfloat16)
    assert w_slab.shape == (W_ROWS, W_COLS)

    c_rows = [normal(keys[0], (VOCAB, HIDDEN)),                        # embedding table
              jnp.asarray(_rope_table_interleaved()),                  # RoPE cos/sin
              jnp.ones((NORM_ROWS, HIDDEN), jnp.float32)]              # RMSNorm weights
    c_slab = jnp.concatenate(c_rows, axis=0)
    assert c_slab.shape == (C_ROWS, HIDDEN)

    return {"c_slab": c_slab, "w_slab": w_slab}


if __name__ == "__main__":
    root = jax.random.PRNGKey(0)
    pkey, skey = jax.random.split(root)
    params = init_params(pkey)

    token0 = jnp.array([[3]], dtype=jnp.int32)                         # [1, 1]
    state_keys = jax.random.split(skey, 2 * N_LAYERS)
    state0_flat = tuple(
        jax.random.normal(state_keys[i], (BATCH, N_HEADS, PAST_SEQ, HEAD_DIM),
                          dtype=jnp.float32)
        for i in range(2 * N_LAYERS)
    )

    outs = decode(params, token0, state0_flat)
    outs = jax.block_until_ready(outs)

    token1 = outs[0]
    assert token1.shape == (1,)
    assert 0 <= int(token1[0]) < VOCAB
    for kv in outs[1:]:
        assert kv.shape == (BATCH, N_HEADS, 1, HEAD_DIM)

    print("KERNEL_OK")
</pallas_src>

<mosaic_0001>
module attributes {stable_mosaic.version = 11 : i64} {
  func.func @_decode_step_kernel(%arg0: i32, %arg1: memref<2xi32, #tpu.memory_space<smem>>, %arg2: memref<136x32xf32, #tpu.memory_space<vmem>>, %arg3: memref<388x160xbf16, #tpu.memory_space<vmem>>, %arg4: memref<32x32xf32, #tpu.memory_space<vmem>>, %arg5: memref<1x1xi32, #tpu.memory_space<vmem>>, %arg6: memref<4x32xf32, #tpu.memory_space<vmem>>, %arg7: memref<9x32xf32, #tpu.memory_space<vmem>>, %arg8: memref<9x32xf32, #tpu.memory_space<vmem>>) attributes {dimension_semantics = [#tpu.dimension_semantics<arbitrary>], iteration_bounds = array<i64: 1>, scalar_prefetch = 1 : i64, scratch_operands = 2 : i64, tpu.core_type = #tpu.core_type<tc>, window_params = [{pipeline_mode = #tpu.pipeline_mode<synchronous>, transform_indices = @transform_0, window_bounds = array<i64: 136, 32>}, {pipeline_mode = #tpu.pipeline_mode<synchronous>, transform_indices = @transform_1, window_bounds = array<i64: 388, 160>}, {pipeline_mode = #tpu.pipeline_mode<synchronous>, transform_indices = @transform_2, window_bounds = array<i64: 32, 32>}, {pipeline_mode = #tpu.pipeline_mode<synchronous>, transform_indices = @transform_3, window_bounds = array<i64: 1, 1>}, {pipeline_mode = #tpu.pipeline_mode<synchronous>, transform_indices = @transform_4, window_bounds = array<i64: 4, 32>}]} {
    %c0 = arith.constant 0 : index
    %0 = memref.load %arg1[%c0] : memref<2xi32, #tpu.memory_space<smem>>
    %c1 = arith.constant 1 : index
    %1 = memref.load %arg1[%c1] : memref<2xi32, #tpu.memory_space<smem>>
    %c0_i32 = arith.constant 0 : i32
    %2 = arith.addi %c0_i32, %0 : i32
    %3 = arith.index_cast %2 : i32 to index
    %c0_0 = arith.constant 0 : index
    %4 = vector.load %arg2[%3, %c0_0] : memref<136x32xf32, #tpu.memory_space<vmem>>, vector<1x32xf32>
    %c2_i32 = arith.constant 2 : i32
    %5 = arith.muli %c2_i32, %1 : i32
    %c64_i32 = arith.constant 64 : i32
    %6 = arith.addi %c64_i32, %5 : i32
    %7 = arith.index_cast %6 : i32 to index
    %c0_1 = arith.constant 0 : index
    %8 = vector.load %arg2[%7, %c0_1] : memref<136x32xf32, #tpu.memory_space<vmem>>, vector<1x32xf32>
    %c2_i32_2 = arith.constant 2 : i32
    %9 = arith.muli %c2_i32_2, %1 : i32
    %c64_i32_3 = arith.constant 64 : i32
    %10 = arith.addi %c64_i32_3, %9 : i32
    %c1_i32 = arith.constant 1 : i32
    %11 = arith.addi %10, %c1_i32 : i32
    %12 = arith.index_cast %11 : i32 to index
    %c0_4 = arith.constant 0 : index
    %13 = vector.load %arg2[%12, %c0_4] : memref<136x32xf32, #tpu.memory_space<vmem>>, vector<1x32xf32>
    %c352 = arith.constant 352 : index
    %c0_5 = arith.constant 0 : index
    %14 = vector.load %arg3[%c352, %c0_5] : memref<388x160xbf16, #tpu.memory_space<vmem>>, vector<32x4xbf16>
    %c384 = arith.constant 384 : index
    %c0_6 = arith.constant 0 : index
    %15 = vector.load %arg3[%c384, %c0_6] : memref<388x160xbf16, #tpu.memory_space<vmem>>, vector<4x32xbf16>
    %c128 = arith.constant 128 : index
    %c0_7 = arith.constant 0 : index
    %16 = vector.load %arg2[%c128, %c0_7] : memref<136x32xf32, #tpu.memory_space<vmem>>, vector<1x32xf32>
    %c129 = arith.constant 129 : index
    %c0_8 = arith.constant 0 : index
    %17 = vector.load %arg2[%c129, %c0_8] : memref<136x32xf32, #tpu.memory_space<vmem>>, vector<1x32xf32>
    %18 = arith.mulf %4, %4 : vector<1x32xf32>
    %cst = arith.constant dense<0.000000e+00> : vector<1xf32>
    %19 = vector.multi_reduction <add>, %18, %cst [1] : vector<1x32xf32> to vector<1xf32>
    %20 = vector.shape_cast %19 : vector<1xf32> to vector<1x1xf32>
    %cst_9 = arith.constant 3.200000e+01 : f32
    %21 = vector.broadcast %cst_9 : f32 to vector<1x1xf32>
    %22 = arith.divf %20, %21 : vector<1x1xf32>
    %cst_10 = arith.constant 9.99999974E-6 : f32
    %23 = vector.broadcast %cst_10 : f32 to vector<1x1xf32>
    %24 = arith.addf %22, %23 : vector<1x1xf32>
    %25 = math.rsqrt %24 : vector<1x1xf32>
    %26 = vector.broadcast %25 : vector<1x1xf32> to vector<1x32xf32>
    %27 = arith.mulf %4, %26 : vector<1x32xf32>
    %28 = arith.mulf %27, %16 : vector<1x32xf32>
    %29 = arith.truncf %28 : vector<1x32xf32> to vector<1x32xbf16>
    %c0_11 = arith.constant 0 : index
    %c0_12 = arith.constant 0 : index
    %30 = vector.load %arg3[%c0_11, %c0_12] : memref<388x160xbf16, #tpu.memory_space<vmem>>, vector<32x160xbf16>
    %cst_13 = arith.constant dense<0.000000e+00> : vector<1x160xf32>
    %31 = tpu.matmul %29, %30, %cst_13 {dimension_numbers = #tpu.dot_dimension_numbers<[1], [0], [0], [1], [0, 0, 1, 1], [], []>} : vector<1x32xbf16>, vector<32x160xbf16>, vector<1x160xf32> -> vector<1x160xf32>
    %32 = vector.extract_strided_slice %31 {offsets = [0, 0], sizes = [1, 32], strides = [1, 1]} : vector<1x160xf32> to vector<1x32xf32>
    %33 = vector.extract_strided_slice %31 {offsets = [0, 32], sizes = [1, 32], strides = [1, 1]} : vector<1x160xf32> to vector<1x32xf32>
    %34 = vector.extract_strided_slice %31 {offsets = [0, 64], sizes = [1, 32], strides = [1, 1]} : vector<1x160xf32> to vector<1x32xf32>
    %35 = vector.extract_strided_slice %31 {offsets = [0, 96], sizes = [1, 32], strides = [1, 1]} : vector<1x160xf32> to vector<1x32xf32>
    %36 = vector.extract_strided_slice %31 {offsets = [0, 128], sizes = [1, 32], strides = [1, 1]} : vector<1x160xf32> to vector<1x32xf32>
    %37 = arith.mulf %32, %8 : vector<1x32xf32>
    %38 = arith.mulf %35, %13 : vector<1x32xf32>
    %39 = arith.addf %37, %38 : vector<1x32xf32>
    %40 = arith.mulf %33, %8 : vector<1x32xf32>
    %41 = arith.mulf %36, %13 : vector<1x32xf32>
    %42 = arith.addf %40, %41 : vector<1x32xf32>
    %c0_14 = arith.constant 0 : index
    %c0_15 = arith.constant 0 : index
    %43 = vector.load %arg6[%c0_14, %c0_15] : memref<4x32xf32, #tpu.memory_space<vmem>>, vector<1x32xf32>
    tpu.vector_store %arg6[%c0_14, %c0_15], %42 {strides = array<i32>} : memref<4x32xf32, #tpu.memory_space<vmem>>, vector<1x32xf32>,
    %c1_16 = arith.constant 1 : index
    %c0_17 = arith.constant 0 : index
    %44 = vector.load %arg6[%c1_16, %c0_17] : memref<4x32xf32, #tpu.memory_space<vmem>>, vector<1x32xf32>
    tpu.vector_store %arg6[%c1_16, %c0_17], %34 {strides = array<i32>} : memref<4x32xf32, #tpu.memory_space<vmem>>, vector<1x32xf32>,
    %c0_18 = arith.constant 0 : index
    %c0_19 = arith.constant 0 : index
    %45 = vector.load %arg4[%c0_18, %c0_19] : memref<32x32xf32, #tpu.memory_space<vmem>>, vector<8x32xf32>
    %c0_20 = arith.constant 0 : index
    %c0_21 = arith.constant 0 : index
    %46 = vector.load %arg7[%c0_20, %c0_21] : memref<9x32xf32, #tpu.memory_space<vmem>>, vector<8x32xf32>
    tpu.vector_store %arg7[%c0_20, %c0_21], %45 {strides = array<i32>} : memref<9x32xf32, #tpu.memory_space<vmem>>, vector<8x32xf32>,
    %c8 = arith.constant 8 : index
    %c0_22 = arith.constant 0 : index
    %47 = vector.load %arg7[%c8, %c0_22] : memref<9x32xf32, #tpu.memory_space<vmem>>, vector<1x32xf32>
    tpu.vector_store %arg7[%c8, %c0_22], %42 {strides = array<i32>} : memref<9x32xf32, #tpu.memory_space<vmem>>, vector<1x32xf32>,
    %c8_23 = arith.constant 8 : index
    %c0_24 = arith.constant 0 : index
    %48 = vector.load %arg4[%c8_23, %c0_24] : memref<32x32xf32, #tpu.memory_space<vmem>>, vector<8x32xf32>
    %c0_25 = arith.constant 0 : index
    %c0_26 = arith.constant 0 : index
    %49 = vector.load %arg8[%c0_25, %c0_26] : memref<9x32xf32, #tpu.memory_space<vmem>>, vector<8x32xf32>
    tpu.vector_store %arg8[%c0_25, %c0_26], %48 {strides = array<i32>} : memref<9x32xf32, #tpu.memory_space<vmem>>, vector<8x32xf32>,
    %c8_27 = arith.constant 8 : index
    %c0_28 = arith.constant 0 : index
    %50 = vector.load %arg8[%c8_27, %c0_28] : memref<9x32xf32, #tpu.memory_space<vmem>>, vector<1x32xf32>
    tpu.vector_store %arg8[%c8_27, %c0_28], %34 {strides = array<i32>} : memref<9x32xf32, #tpu.memory_space<vmem>>, vector<1x32xf32>,
    %c0_29 = arith.constant 0 : index
    %c0_30 = arith.constant 0 : index
    %51 = vector.load %arg7[%c0_29, %c0_30] : memref<9x32xf32, #tpu.memory_space<vmem>>, vector<9x32xf32>
    %c0_31 = arith.constant 0 : index
    %c0_32 = arith.constant 0 : index
    %52 = vector.load %arg8[%c0_31, %c0_32] : memref<9x32xf32, #tpu.memory_space<vmem>>, vector<9x32xf32>
    %cst_33 = arith.constant 0.353553385 : f32
    %53 = vector.broadcast %cst_33 : f32 to vector<1x32xf32>
    %54 = arith.mulf %39, %53 : vector<1x32xf32>
    %55 = vector.broadcast %54 : vector<1x32xf32> to vector<9x32xf32>
    %56 = arith.mulf %51, %55 : vector<9x32xf32>
    %57 = arith.truncf %56 : vector<9x32xf32> to vector<9x32xbf16>
    %cst_34 = arith.constant dense<0.000000e+00> : vector<9x4xf32>
    %58 = tpu.matmul %57, %14, %cst_34 {dimension_numbers = #tpu.dot_dimension_numbers<[1], [0], [0], [1], [0, 0, 1, 1], [], []>} : vector<9x32xbf16>, vector<32x4xbf16>, vector<9x4xf32> -> vector<9x4xf32>
    %cst_35 = arith.constant dense<0xFF800000> : vector<4xf32>
    %59 = vector.multi_reduction <maximumf>, %58, %cst_35 [0] : vector<9x4xf32> to vector<4xf32>
    %60 = vector.shape_cast %59 : vector<4xf32> to vector<1x4xf32>
    %61 = vector.broadcast %60 : vector<1x4xf32> to vector<9x4xf32>
    %62 = arith.subf %58, %61 : vector<9x4xf32>
    %63 = math.exp %62 : vector<9x4xf32>
    %cst_36 = arith.constant dense<0.000000e+00> : vector<4xf32>
    %64 = vector.multi_reduction <add>, %63, %cst_36 [0] : vector<9x4xf32> to vector<4xf32>
    %65 = vector.shape_cast %64 : vector<4xf32> to vector<1x4xf32>
    %66 = tpu.reciprocal %65 {approx = true} : vector<1x4xf32> -> vector<1x4xf32>
    %67 = vector.broadcast %66 : vector<1x4xf32> to vector<9x4xf32>
    %68 = arith.mulf %63, %67 : vector<9x4xf32>
    %69 = arith.truncf %68 : vector<9x4xf32> to vector<9x4xbf16>
    %cst_37 = arith.constant dense<0.000000e+00> : vector<9x32xf32>
    %70 = tpu.matmul %69, %15, %cst_37 {dimension_numbers = #tpu.dot_dimension_numbers<[1], [0], [0], [1], [0, 0, 1, 1], [], []>} : vector<9x4xbf16>, vector<4x32xbf16>, vector<9x32xf32> -> vector<9x32xf32>
    %71 = arith.mulf %70, %52 : vector<9x32xf32>
    %cst_38 = arith.constant dense<0.000000e+00> : vector<32xf32>
    %72 = vector.multi_reduction <add>, %71, %cst_38 [0] : vector<9x32xf32> to vector<32xf32>
    %73 = vector.shape_cast %72 : vector<32xf32> to vector<1x32xf32>
    %74 = arith.truncf %73 : vector<1x32xf32> to vector<1x32xbf16>
    %c32 = arith.constant 32 : index
    %c0_39 = arith.constant 0 : index
    %75 = vector.load %arg3[%c32, %c0_39] : memref<388x160xbf16, #tpu.memory_space<vmem>>, vector<32x32xbf16>
    %cst_40 = arith.constant dense<0.000000e+00> : vector<1x32xf32>
    %76 = tpu.matmul %74, %75, %cst_40 {dimension_numbers = #tpu.dot_dimension_numbers<[1], [0], [0], [1], [0, 0, 1, 1], [], []>} : vector<1x32xbf16>, vector<32x32xbf16>, vector<1x32xf32> -> vector<1x32xf32>
    %77 = arith.addf %4, %76 : vector<1x32xf32>
    %78 = arith.mulf %77, %77 : vector<1x32xf32>
    %cst_41 = arith.constant dense<0.000000e+00> : vector<1xf32>
    %79 = vector.multi_reduction <add>, %78, %cst_41 [1] : vector<1x32xf32> to vector<1xf32>
    %80 = vector.shape_cast %79 : vector<1xf32> to vector<1x1xf32>
    %cst_42 = arith.constant 3.200000e+01 : f32
    %81 = vector.broadcast %cst_42 : f32 to vector<1x1xf32>
    %82 = arith.divf %80, %81 : vector<1x1xf32>
    %cst_43 = arith.constant 9.99999974E-6 : f32
    %83 = vector.broadcast %cst_43 : f32 to vector<1x1xf32>
    %84 = arith.addf %82, %83 : vector<1x1xf32>
    %85 = math.rsqrt %84 : vector<1x1xf32>
    %86 = vector.broadcast %85 : vector<1x1xf32> to vector<1x32xf32>
    %87 = arith.mulf %77, %86 : vector<1x32xf32>
    %88 = arith.mulf %87, %17 : vector<1x32xf32>
    %89 = arith.truncf %88 : vector<1x32xf32> to vector<1x32xbf16>
    %c64 = arith.constant 64 : index
    %c0_44 = arith.constant 0 : index
    %90 = vector.load %arg3[%c64, %c0_44] : memref<388x160xbf16, #tpu.memory_space<vmem>>, vector<32x128xbf16>
    %cst_45 = arith.constant dense<0.000000e+00> : vector<1x128xf32>
    %91 = tpu.matmul %89, %90, %cst_45 {dimension_numbers = #tpu.dot_dimension_numbers<[1], [0], [0], [1], [0, 0, 1, 1], [], []>} : vector<1x32xbf16>, vector<32x128xbf16>, vector<1x128xf32> -> vector<1x128xf32>
    %92 = vector.extract_strided_slice %91 {offsets = [0, 0], sizes = [1, 64], strides = [1, 1]} : vector<1x128xf32> to vector<1x64xf32>
    %93 = vector.extract_strided_slice %91 {offsets = [0, 64], sizes = [1, 64], strides = [1, 1]} : vector<1x128xf32> to vector<1x64xf32>
    %94 = arith.negf %92 : vector<1x64xf32>
    %95 = math.exp %94 : vector<1x64xf32>
    %cst_46 = arith.constant 1.000000e+00 : f32
    %96 = vector.broadcast %cst_46 : f32 to vector<1x64xf32>
    %97 = arith.addf %96, %95 : vector<1x64xf32>
    %98 = arith.divf %96, %97 : vector<1x64xf32>
    %99 = arith.mulf %92, %98 : vector<1x64xf32>
    %100 = arith.mulf %99, %93 : vector<1x64xf32>
    %101 = arith.truncf %100 : vector<1x64xf32> to vector<1x64xbf16>
    %c96 = arith.constant 96 : index
    %c0_47 = arith.constant 0 : index
    %102 = vector.load %arg3[%c96, %c0_47] : memref<388x160xbf16, #tpu.memory_space<vmem>>, vector<64x32xbf16>
    %cst_48 = arith.constant dense<0.000000e+00> : vector<1x32xf32>
    %103 = tpu.matmul %101, %102, %cst_48 {dimension_numbers = #tpu.dot_dimension_numbers<[1], [0], [0], [1], [0, 0, 1, 1], [], []>} : vector<1x64xbf16>, vector<64x32xbf16>, vector<1x32xf32> -> vector<1x32xf32>
    %104 = arith.addf %77, %103 : vector<1x32xf32>
    %c130 = arith.constant 130 : index
    %c0_49 = arith.constant 0 : index
    %105 = vector.load %arg2[%c130, %c0_49] : memref<136x32xf32, #tpu.memory_space<vmem>>, vector<1x32xf32>
    %c131 = arith.constant 131 : index
    %c0_50 = arith.constant 0 : index
    %106 = vector.load %arg2[%c131, %c0_50] : memref<136x32xf32, #tpu.memory_space<vmem>>, vector<1x32xf32>
    %107 = arith.mulf %104, %104 : vector<1x32xf32>
    %cst_51 = arith.constant dense<0.000000e+00> : vector<1xf32>
    %108 = vector.multi_reduction <add>, %107, %cst_51 [1] : vector<1x32xf32> to vector<1xf32>
    %109 = vector.shape_cast %108 : vector<1xf32> to vector<1x1xf32>
    %cst_52 = arith.constant 3.200000e+01 : f32
    %110 = vector.broadcast %cst_52 : f32 to vector<1x1xf32>
    %111 = arith.divf %109, %110 : vector<1x1xf32>
    %cst_53 = arith.constant 9.99999974E-6 : f32
    %112 = vector.broadcast %cst_53 : f32 to vector<1x1xf32>
    %113 = arith.addf %111, %112 : vector<1x1xf32>
    %114 = math.rsqrt %113 : vector<1x1xf32>
    %115 = vector.broadcast %114 : vector<1x1xf32> to vector<1x32xf32>
    %116 = arith.mulf %104, %115 : vector<1x32xf32>
    %117 = arith.mulf %116, %105 : vector<1x32xf32>
    %118 = arith.truncf %117 : vector<1x32xf32> to vector<1x32xbf16>
    %c160 = arith.constant 160 : index
    %c0_54 = arith.constant 0 : index
    %119 = vector.load %arg3[%c160, %c0_54] : memref<388x160xbf16, #tpu.memory_space<vmem>>, vector<32x160xbf16>
    %cst_55 = arith.constant dense<0.000000e+00> : vector<1x160xf32>
    %120 = tpu.matmul %118, %119, %cst_55 {dimension_numbers = #tpu.dot_dimension_numbers<[1], [0], [0], [1], [0, 0, 1, 1], [], []>} : vector<1x32xbf16>, vector<32x160xbf16>, vector<1x160xf32> -> vector<1x160xf32>
    %121 = vector.extract_strided_slice %120 {offsets = [0, 0], sizes = [1, 32], strides = [1, 1]} : vector<1x160xf32> to vector<1x32xf32>
    %122 = vector.extract_strided_slice %120 {offsets = [0, 32], sizes = [1, 32], strides = [1, 1]} : vector<1x160xf32> to vector<1x32xf32>
    %123 = vector.extract_strided_slice %120 {offsets = [0, 64], sizes = [1, 32], strides = [1, 1]} : vector<1x160xf32> to vector<1x32xf32>
    %124 = vector.extract_strided_slice %120 {offsets = [0, 96], sizes = [1, 32], strides = [1, 1]} : vector<1x160xf32> to vector<1x32xf32>
    %125 = vector.extract_strided_slice %120 {offsets = [0, 128], sizes = [1, 32], strides = [1, 1]} : vector<1x160xf32> to vector<1x32xf32>
    %126 = arith.mulf %121, %8 : vector<1x32xf32>
    %127 = arith.mulf %124, %13 : vector<1x32xf32>
    %128 = arith.addf %126, %127 : vector<1x32xf32>
    %129 = arith.mulf %122, %8 : vector<1x32xf32>
    %130 = arith.mulf %125, %13 : vector<1x32xf32>
    %131 = arith.addf %129, %130 : vector<1x32xf32>
    %c2 = arith.constant 2 : index
    %c0_56 = arith.constant 0 : index
    %132 = vector.load %arg6[%c2, %c0_56] : memref<4x32xf32, #tpu.memory_space<vmem>>, vector<1x32xf32>
    tpu.vector_store %arg6[%c2, %c0_56], %131 {strides = array<i32>} : memref<4x32xf32, #tpu.memory_space<vmem>>, vector<1x32xf32>,
    %c3 = arith.constant 3 : index
    %c0_57 = arith.constant 0 : index
    %133 = vector.load %arg6[%c3, %c0_57] : memref<4x32xf32, #tpu.memory_space<vmem>>, vector<1x32xf32>
    tpu.vector_store %arg6[%c3, %c0_57], %123 {strides = array<i32>} : memref<4x32xf32, #tpu.memory_space<vmem>>, vector<1x32xf32>,
    %c16 = arith.constant 16 : index
    %c0_58 = arith.constant 0 : index
    %134 = vector.load %arg4[%c16, %c0_58] : memref<32x32xf32, #tpu.memory_space<vmem>>, vector<8x32xf32>
    %c0_59 = arith.constant 0 : index
    %c0_60 = arith.constant 0 : index
    %135 = vector.load %arg7[%c0_59, %c0_60] : memref<9x32xf32, #tpu.memory_space<vmem>>, vector<8x32xf32>
    tpu.vector_store %arg7[%c0_59, %c0_60], %134 {strides = array<i32>} : memref<9x32xf32, #tpu.memory_space<vmem>>, vector<8x32xf32>,
    %c8_61 = arith.constant 8 : index
    %c0_62 = arith.constant 0 : index
    %136 = vector.load %arg7[%c8_61, %c0_62] : memref<9x32xf32, #tpu.memory_space<vmem>>, vector<1x32xf32>
    tpu.vector_store %arg7[%c8_61, %c0_62], %131 {strides = array<i32>} : memref<9x32xf32, #tpu.memory_space<vmem>>, vector<1x32xf32>,
    %c24 = arith.constant 24 : index
    %c0_63 = arith.constant 0 : index
    %137 = vector.load %arg4[%c24, %c0_63] : memref<32x32xf32, #tpu.memory_space<vmem>>, vector<8x32xf32>
    %c0_64 = arith.constant 0 : index
    %c0_65 = arith.constant 0 : index
    %138 = vector.load %arg8[%c0_64, %c0_65] : memref<9x32xf32, #tpu.memory_space<vmem>>, vector<8x32xf32>
    tpu.vector_store %arg8[%c0_64, %c0_65], %137 {strides = array<i32>} : memref<9x32xf32, #tpu.memory_space<vmem>>, vector<8x32xf32>,
    %c8_66 = arith.constant 8 : index
    %c0_67 = arith.constant 0 : index
    %139 = vector.load %arg8[%c8_66, %c0_67] : memref<9x32xf32, #tpu.memory_space<vmem>>, vector<1x32xf32>
    tpu.vector_store %arg8[%c8_66, %c0_67], %123 {strides = array<i32>} : memref<9x32xf32, #tpu.memory_space<vmem>>, vector<1x32xf32>,
    %c0_68 = arith.constant 0 : index
    %c0_69 = arith.constant 0 : index
    %140 = vector.load %arg7[%c0_68, %c0_69] : memref<9x32xf32, #tpu.memory_space<vmem>>, vector<9x32xf32>
    %c0_70 = arith.constant 0 : index
    %c0_71 = arith.constant 0 : index
    %141 = vector.load %arg8[%c0_70, %c0_71] : memref<9x32xf32, #tpu.memory_space<vmem>>, vector<9x32xf32>
    %cst_72 = arith.constant 0.353553385 : f32
    %142 = vector.broadcast %cst_72 : f32 to vector<1x32xf32>
    %143 = arith.mulf %128, %142 : vector<1x32xf32>
    %144 = vector.broadcast %143 : vector<1x32xf32> to vector<9x32xf32>
    %145 = arith.mulf %140, %144 : vector<9x32xf32>
    %146 = arith.truncf %145 : vector<9x32xf32> to vector<9x32xbf16>
    %cst_73 = arith.constant dense<0.000000e+00> : vector<9x4xf32>
    %147 = tpu.matmul %146, %14, %cst_73 {dimension_numbers = #tpu.dot_dimension_numbers<[1], [0], [0], [1], [0, 0, 1, 1], [], []>} : vector<9x32xbf16>, vector<32x4xbf16>, vector<9x4xf32> -> vector<9x4xf32>
    %cst_74 = arith.constant dense<0xFF800000> : vector<4xf32>
    %148 = vector.multi_reduction <maximumf>, %147, %cst_74 [0] : vector<9x4xf32> to vector<4xf32>
    %149 = vector.shape_cast %148 : vector<4xf32> to vector<1x4xf32>
    %150 = vector.broadcast %149 : vector<1x4xf32> to vector<9x4xf32>
    %151 = arith.subf %147, %150 : vector<9x4xf32>
    %152 = math.exp %151 : vector<9x4xf32>
    %cst_75 = arith.constant dense<0.000000e+00> : vector<4xf32>
    %153 = vector.multi_reduction <add>, %152, %cst_75 [0] : vector<9x4xf32> to vector<4xf32>
    %154 = vector.shape_cast %153 : vector<4xf32> to vector<1x4xf32>
    %155 = tpu.reciprocal %154 {approx = true} : vector<1x4xf32> -> vector<1x4xf32>
    %156 = vector.broadcast %155 : vector<1x4xf32> to vector<9x4xf32>
    %157 = arith.mulf %152, %156 : vector<9x4xf32>
    %158 = arith.truncf %157 : vector<9x4xf32> to vector<9x4xbf16>
    %cst_76 = arith.constant dense<0.000000e+00> : vector<9x32xf32>
    %159 = tpu.matmul %158, %15, %cst_76 {dimension_numbers = #tpu.dot_dimension_numbers<[1], [0], [0], [1], [0, 0, 1, 1], [], []>} : vector<9x4xbf16>, vector<4x32xbf16>, vector<9x32xf32> -> vector<9x32xf32>
    %160 = arith.mulf %159, %141 : vector<9x32xf32>
    %cst_77 = arith.constant dense<0.000000e+00> : vector<32xf32>
    %161 = vector.multi_reduction <add>, %160, %cst_77 [0] : vector<9x32xf32> to vector<32xf32>
    %162 = vector.shape_cast %161 : vector<32xf32> to vector<1x32xf32>
    %163 = arith.truncf %162 : vector<1x32xf32> to vector<1x32xbf16>
    %c192 = arith.constant 192 : index
    %c0_78 = arith.constant 0 : index
    %164 = vector.load %arg3[%c192, %c0_78] : memref<388x160xbf16, #tpu.memory_space<vmem>>, vector<32x32xbf16>
    %cst_79 = arith.constant dense<0.000000e+00> : vector<1x32xf32>
    %165 = tpu.matmul %163, %164, %cst_79 {dimension_numbers = #tpu.dot_dimension_numbers<[1], [0], [0], [1], [0, 0, 1, 1], [], []>} : vector<1x32xbf16>, vector<32x32xbf16>, vector<1x32xf32> -> vector<1x32xf32>
    %166 = arith.addf %104, %165 : vector<1x32xf32>
    %167 = arith.mulf %166, %166 : vector<1x32xf32>
    %cst_80 = arith.constant dense<0.000000e+00> : vector<1xf32>
    %168 = vector.multi_reduction <add>, %167, %cst_80 [1] : vector<1x32xf32> to vector<1xf32>
    %169 = vector.shape_cast %168 : vector<1xf32> to vector<1x1xf32>
    %cst_81 = arith.constant 3.200000e+01 : f32
    %170 = vector.broadcast %cst_81 : f32 to vector<1x1xf32>
    %171 = arith.divf %169, %170 : vector<1x1xf32>
    %cst_82 = arith.constant 9.99999974E-6 : f32
    %172 = vector.broadcast %cst_82 : f32 to vector<1x1xf32>
    %173 = arith.addf %171, %172 : vector<1x1xf32>
    %174 = math.rsqrt %173 : vector<1x1xf32>
    %175 = vector.broadcast %174 : vector<1x1xf32> to vector<1x32xf32>
    %176 = arith.mulf %166, %175 : vector<1x32xf32>
    %177 = arith.mulf %176, %106 : vector<1x32xf32>
    %178 = arith.truncf %177 : vector<1x32xf32> to vector<1x32xbf16>
    %c224 = arith.constant 224 : index
    %c0_83 = arith.constant 0 : index
    %179 = vector.load %arg3[%c224, %c0_83] : memref<388x160xbf16, #tpu.memory_space<vmem>>, vector<32x128xbf16>
    %cst_84 = arith.constant dense<0.000000e+00> : vector<1x128xf32>
    %180 = tpu.matmul %178, %179, %cst_84 {dimension_numbers = #tpu.dot_dimension_numbers<[1], [0], [0], [1], [0, 0, 1, 1], [], []>} : vector<1x32xbf16>, vector<32x128xbf16>, vector<1x128xf32> -> vector<1x128xf32>
    %181 = vector.extract_strided_slice %180 {offsets = [0, 0], sizes = [1, 64], strides = [1, 1]} : vector<1x128xf32> to vector<1x64xf32>
    %182 = vector.extract_strided_slice %180 {offsets = [0, 64], sizes = [1, 64], strides = [1, 1]} : vector<1x128xf32> to vector<1x64xf32>
    %183 = arith.negf %181 : vector<1x64xf32>
    %184 = math.exp %183 : vector<1x64xf32>
    %cst_85 = arith.constant 1.000000e+00 : f32
    %185 = vector.broadcast %cst_85 : f32 to vector<1x64xf32>
    %186 = arith.addf %185, %184 : vector<1x64xf32>
    %187 = arith.divf %185, %186 : vector<1x64xf32>
    %188 = arith.mulf %181, %187 : vector<1x64xf32>
    %189 = arith.mulf %188, %182 : vector<1x64xf32>
    %190 = arith.truncf %189 : vector<1x64xf32> to vector<1x64xbf16>
    %c256 = arith.constant 256 : index
    %c0_86 = arith.constant 0 : index
    %191 = vector.load %arg3[%c256, %c0_86] : memref<388x160xbf16, #tpu.memory_space<vmem>>, vector<64x32xbf16>
    %cst_87 = arith.constant dense<0.000000e+00> : vector<1x32xf32>
    %192 = tpu.matmul %190, %191, %cst_87 {dimension_numbers = #tpu.dot_dimension_numbers<[1], [0], [0], [1], [0, 0, 1, 1], [], []>} : vector<1x64xbf16>, vector<64x32xbf16>, vector<1x32xf32> -> vector<1x32xf32>
    %193 = arith.addf %166, %192 : vector<1x32xf32>
    %c132 = arith.constant 132 : index
    %c0_88 = arith.constant 0 : index
    %194 = vector.load %arg2[%c132, %c0_88] : memref<136x32xf32, #tpu.memory_space<vmem>>, vector<1x32xf32>
    %195 = arith.mulf %193, %193 : vector<1x32xf32>
    %cst_89 = arith.constant dense<0.000000e+00> : vector<1xf32>
    %196 = vector.multi_reduction <add>, %195, %cst_89 [1] : vector<1x32xf32> to vector<1xf32>
    %197 = vector.shape_cast %196 : vector<1xf32> to vector<1x1xf32>
    %cst_90 = arith.constant 3.200000e+01 : f32
    %198 = vector.broadcast %cst_90 : f32 to vector<1x1xf32>
    %199 = arith.divf %197, %198 : vector<1x1xf32>
    %cst_91 = arith.constant 9.99999974E-6 : f32
    %200 = vector.broadcast %cst_91 : f32 to vector<1x1xf32>
    %201 = arith.addf %199, %200 : vector<1x1xf32>
    %202 = math.rsqrt %201 : vector<1x1xf32>
    %203 = vector.broadcast %202 : vector<1x1xf32> to vector<1x32xf32>
    %204 = arith.mulf %193, %203 : vector<1x32xf32>
    %205 = arith.mulf %204, %194 : vector<1x32xf32>
    %206 = arith.truncf %205 : vector<1x32xf32> to vector<1x32xbf16>
    %c320 = arith.constant 320 : index
    %c0_92 = arith.constant 0 : index
    %207 = vector.load %arg3[%c320, %c0_92] : memref<388x160xbf16, #tpu.memory_space<vmem>>, vector<32x64xbf16>
    %cst_93 = arith.constant dense<0.000000e+00> : vector<1x64xf32>
    %208 = tpu.matmul %206, %207, %cst_93 {dimension_numbers = #tpu.dot_dimension_numbers<[1], [0], [0], [1], [0, 0, 1, 1], [], []>} : vector<1x32xbf16>, vector<32x64xbf16>, vector<1x64xf32> -> vector<1x64xf32>
    %209 = tpu.iota {dimensions = array<i32: 1>} : vector<1x64xi32>
    %210 = arith.sitofp %209 : vector<1x64xi32> to vector<1x64xf32>
    %cst_94 = arith.constant dense<0xFF800000> : vector<1xf32>
    %211 = vector.multi_reduction <maximumf>, %208, %cst_94 [1] : vector<1x64xf32> to vector<1xf32>
    %212 = vector.shape_cast %211 : vector<1xf32> to vector<1x1xf32>
    %213 = vector.broadcast %212 : vector<1x1xf32> to vector<1x64xf32>
    %214 = arith.cmpf oge, %208, %213 : vector<1x64xf32>
    %cst_95 = arith.constant 6.400000e+01 : f32
    %215 = vector.broadcast %cst_95 : f32 to vector<1x64xf32>
    %216 = arith.select %214, %210, %215 : vector<1x64xi1>, vector<1x64xf32>
    %cst_96 = arith.constant dense<0x7F800000> : vector<1xf32>
    %217 = vector.multi_reduction <minimumf>, %216, %cst_96 [1] : vector<1x64xf32> to vector<1xf32>
    %218 = vector.shape_cast %217 : vector<1xf32> to vector<1x1xf32>
    %219 = arith.fptosi %218 : vector<1x1xf32> to vector<1x1xi32>
    %c0_97 = arith.constant 0 : index
    %c0_98 = arith.constant 0 : index
    %220 = vector.load %arg5[%c0_97, %c0_98] : memref<1x1xi32, #tpu.memory_space<vmem>>, vector<1x1xi32>
    tpu.vector_store %arg5[%c0_97, %c0_98], %219 {strides = array<i32>} : memref<1x1xi32, #tpu.memory_space<vmem>>, vector<1x1xi32>,
    return
  }
  func.func @transform_0(%arg0: i32, %arg1: memref<2xi32, #tpu.memory_space<smem>>) -> (i32, i32) {
    %c0_i32 = arith.constant 0 : i32
    %c0_i32_0 = arith.constant 0 : i32
    %c0_i32_1 = arith.constant 0 : i32
    return %c0_i32, %c0_i32_0 : i32, i32
  }
  func.func @transform_1(%arg0: i32, %arg1: memref<2xi32, #tpu.memory_space<smem>>) -> (i32, i32) {
    %c0_i32 = arith.constant 0 : i32
    %c0_i32_0 = arith.constant 0 : i32
    %c0_i32_1 = arith.constant 0 : i32
    return %c0_i32, %c0_i32_0 : i32, i32
  }
  func.func @transform_2(%arg0: i32, %arg1: memref<2xi32, #tpu.memory_space<smem>>) -> (i32, i32) {
    %c0_i32 = arith.constant 0 : i32
    %c0_i32_0 = arith.constant 0 : i32
    %c0_i32_1 = arith.constant 0 : i32
    return %c0_i32, %c0_i32_0 : i32, i32
  }
  func.func @transform_3(%arg0: i32, %arg1: memref<2xi32, #tpu.memory_space<smem>>) -> (i32, i32) {
    %c0_i32 = arith.constant 0 : i32
    %c0_i32_0 = arith.constant 0 : i32
    %c0_i32_1 = arith.constant 0 : i32
    return %c0_i32, %c0_i32_0 : i32, i32
  }
  func.func @transform_4(%arg0: i32, %arg1: memref<2xi32, #tpu.memory_space<smem>>) -> (i32, i32) {
    %c0_i32 = arith.constant 0 : i32
    %c0_i32_0 = arith.constant 0 : i32
    %c0_i32_1 = arith.constant 0 : i32
    return %c0_i32, %c0_i32_0 : i32, i32
  }
}

</mosaic_0001>

<bundles_post_ra>
// kernel: squeeze.17
= control target key start
LH: loop header
LB: loop body
LE: loop exit
PB: predicated region body
PF: predicated region fallthrough
CT: control target
= control target key end

     0   :  { %s101_s0 = inlined_call_operand.vmem [shape: f32[32], index: 0, kind: input, shape index: {}]   ;;  %s102_s1 = inlined_call_operand.hbm [shape: f32[1,4,1,8], index: 1, kind: output, shape index: {}]  }
   0x1   :  { %v5_v0 = vld [vmem:[%s101_s0] sm:$0x1] }
   0x2   :  { %6 = vst [vmem:[#allocation3] sm:$0x1] %v5_v0 }
   0x3   :  { %2 = vsyncpa [#allocation1], 0  ;;  %s72_s0 = smov 120   ;;  %s73_s8 = smov 104   ;;  %vm8_vm0 = vcmask 64512  }
   0x4   :  { %s74_s9 = smov 112   ;;  %s75_s10 = smov [#allocation0]  }
   0x5   :  { %s38_s11 = sshll.u32 %s75_s10, 4  ;;  %s39_s11 = int_to_ptr.vmem [resolvable:$true] %s38_s11 }
   0x6   :  { %s48_s12 = scalar_lea.vmem %s39_s11, 64  ;;  %p53_p1 = scmp.lt.s32.totalorder %s39_s11, %s39_s11 }
   0x7   :  { %p49_p0 = scmp.ne.s32.totalorder %s39_s11, %s48_s12  ;;  %p54_p2 = scmp.lt.s32.totalorder %s48_s12, %s48_s12 }
   0x9   :  { %v10_v1 = vld [vmem:[#allocation3] sm:$0x1]   ;;  %p55_p3 = por %p54_p2, %p53_p1 }
   0xa   :  { %v22_v2 = vld [vmem:[#allocation3] sm:$0x1]   ;;  %11 = vrot.lane.b32.xlu0 %v10_v1, %s72_s0 }
   0xb   :  { %23 = vrot.lane.b32.xlu1 %v22_v2, %s73_s8  ;;  %v7_v3 = vld [vmem:[#allocation3] sm:$0x1]   ;;  %p56_p4 = pnand %p55_p3, %p49_p0 }
   0xc   :  { %v16_v4 = vld [vmem:[#allocation3] sm:$0x1]   ;;  %9 = vst.msk [vmem:[#allocation2] sm:$0x1] %vm8_vm0, %v7_v3  }
   0xe   :  { %17 = vrot.lane.b32.xlu0 %v16_v4, %s74_s9 }
  0x7c   :  { %v12_v5 = vpop.permute.xlu0 %11  }
  0x7d   :  { %v24_v6 = vpop.permute.xlu1 %23   ;;  %15 = vst.msk [vmem:[#allocation2 + $0x1] sm:$0x1] %vm8_vm0, %v12_v5  }
  0x7e   :  { %27 = vst.msk [vmem:[#allocation2 + $0x3] sm:$0x1] %vm8_vm0, %v24_v6  }
  0x80   :  { %v18_v7 = vpop.permute.xlu0 %17  }
  0x81   :  { %21 = vst.msk [vmem:[#allocation2 + $0x2] sm:$0x1] %vm8_vm0, %v18_v7  }
  0x88   :  { %v31_v8 = vld [vmem:[#allocation2] sm:$0xf] }
  0x89   :  { %33 = vst [vmem:[#allocation0] sm:$0xf] %v31_v8 }
  0x8a   :  { %59 = shalt.err (!%p56_p4)
}
  0x8b   :  { %s60_s15 = scalar_lea.hbm %s102_s1, 64 }
  0x8c   :  { %p61_p5 = scmp.ne.s32.totalorder %s102_s1, %s60_s15  ;;  %p64_p6 = scmp.lt.u32.totalorder %s60_s15, %s102_s1 }
  0x8e   :  { %p66_p7 = pnand %p64_p6, %p61_p5 }
  0x90   :  { %69 = shalt.err (!%p66_p7)
}
  0x91   :  { %41 = dma.vmem_to_hbm [thread:$0]  %s39_s11, 64, %s102_s1, [#allocation1]  }
  0x92   :  { %70 = dma.done.wait [#allocation1], 64  }
  0x93   :  { %71 = vsyncadd [#allocation1], 4294967232 }
  0x94   :  { %43 = vsyncpa [#allocation1], 1 }

// kernel: llama_decode_step.1
= control target key start
LH: loop header
LB: loop body
LE: loop exit
PB: predicated region body
PF: predicated region fallthrough
CT: control target
= control target key end

     0   :  { %s1740_s0 = inlined_call_operand.vmem [shape: s32[2], index: 0, kind: input, shape index: {}]   ;;  %s1741_s1 = inlined_call_operand.vmem [shape: f32[136,32], index: 1, kind: input, shape index: {}]   ;;  %s1742_s2 = inlined_call_operand.vmem [shape: bf16[388,160], index: 2, kind: input, shape index: {}]   ;;  %s1743_s3 = inlined_call_operand.vmem [shape: f32[32,32], index: 3, kind: input, shape index: {}]   ;;  %s1744_s4 = inlined_call_operand.hbm [shape: s32[1,1], index: 4, kind: output, shape index: {0}]   ;;  %s1745_s5 = inlined_call_operand.vmem [shape: f32[4,32], index: 5, kind: output, shape index: {1}]  }
   0x1   :  { %s11_s20 = sshll.u32 %s1740_s0, 4  ;;  %s12_s20 = int_to_ptr.vmem [resolvable:$true] %s11_s20 }
   0x2   :  { %s1364_s21 = scalar_lea.vmem %s12_s20, 16  ;;  %p1369_p1 = scmp.lt.s32.totalorder %s12_s20, %s12_s20 }
   0x3   :  { %p1365_p0 = scmp.ne.s32.totalorder %s12_s20, %s1364_s21  ;;  %p1370_p2 = scmp.lt.s32.totalorder %s1364_s21, %s1364_s21 }
   0x5   :  { %p1371_p3 = por %p1370_p2, %p1369_p1 }
   0x7   :  { %p1372_p4 = pnand %p1371_p3, %p1365_p0 }
   0x9   :  { %1375 = shalt.err (!%p1372_p4)  }
   0xa   :  { %s1402_s22 = smov [#allocation5]  }
   0xb   :  { %14 = dma.vmem_to_smem %s12_s20, 16, %s1402_s22, [#allocation4] }
   0xc   :  { %1398 = dma.done.wait [#allocation4], 16 }
   0xd   :  { %1399 = vsyncadd [#allocation4], 4294967280 }
   0xe   :  { %16 = sfence }
   0xf   :  { %s25_s23 = sld [smem:[#allocation5]]  ;;  %vm44_vm0 = vcmask 253952  }
  0x15   :  { %s27_s26 = scalar_lea.vmem %s1741_s1, %s25_s23 }
  0x16   :  { %v1446_v0 = vld [vmem:[%s27_s26] sm:$0x1] }
  0x17   :  { %v43_v1 = vmul.f32 %v1446_v0, %v1446_v0 }
  0x19   :  { %v45_v2 = vsel %vm44_vm0, %v43_v1, 0.0 }
  0x1a   :  { %46 = vadd.xlane.f32.xlu0 %v45_v2 }
  0x1b   :  { %17 = vsyncpa [#allocation7], 0  ;;  %v1302_v3 = vld [vmem:[%s1742_s2 + $0x4] ss:$8 sps:$4 sm:$0xff]   ;;  %v1304_v4 = vld [vmem:[%s1742_s2] ss:$8 sps:$4 sm:$0xff]   ;;  %v167_v35 = vlaneseq }
  0x1c   :  { %v1305_v5 = vld [vmem:[%s1742_s2 + $0x14] ss:$8 sps:$4 sm:$0xff]   ;;  %83 = vmatprep.subr.bf16.mxu0 %v1302_v3  ;;  %v1403_v6 = vmov 0   ;;  %v1307_v7 = vld [vmem:[%s1742_s2 + $0x10] ss:$8 sps:$4 sm:$0xff]   ;;  %s1117_s9 = sld [smem:[#allocation5 + $0x1]] }
  0x1d   :  { %115 = vmatprep.mubr.bf16.mxu0 %v1403_v6  ;;  %84 = vmatpush1.bf16.msra.mxu0 %v1304_v4  ;;  %s1404_s14 = smov 32   ;;  %v41_v13 = vld [vmem:[%s1741_s1 + $0x80] sm:$0x1]  ;;  %vm79_vm1 = vcmask 261120   ;;  %s1405_s17 = smov 96   ;;  %v1406_v26 = vmov 0.0  }
  0x1e   :  { %85 = vmatprep.subr.bf16.mxu0 %v1305_v5  ;;  %v156_v23 = vld [vmem:[%s1743_s3] sm:$0xff]  ;;  %1200 = vmatprep.subr.bf16.mxu1 %v1406_v26  ;;  %v643_v27 = vld [vmem:[%s1743_s3 + $0x10] sm:$0xff]  ;;  %vm1407_vm2 = vmmov 0   ;;  %s1408_s26 = smov 64   ;;  %v1525_v37 = vshrl.u32 %v167_v35, 7  ;;  %vm263_vm3 = vcmask 1041408  }
  0x1f   :  { %157 = vst.msk [vmem:[#allocation2] sm:$0xff] %vm79_vm1, %v156_v23  ;;  %v1489_v24 = vld [vmem:[%s1742_s2 + $0x160] ss:$8 sps:$4 sm:$0xff]   ;;  %v1505_v30 = vld [vmem:[%s1742_s2 + $0x170] ss:$8 sps:$4 sm:$0xff]   ;;  %1204 = vmatprep.mubr.msk.bf16.mxu1 %vm1407_vm2, %v1406_v26  ;;  %vm230_vm4 = vcmask 31744  }
  0x20   :  { %1201 = vmatpush3.bf16.msra.mxu1 %v1489_v24  ;;  %v169_v40 = vsub.s32 0, %v1525_v37  ;;  %v40_v49 = vld [vmem:[%s1742_s2 + $0x180] sm:$0x3]  ;;  %v159_v51 = vld [vmem:[%s1743_s3 + $0x8] sm:$0xff]  ;;  %vm232_vm5 = vcmask 24576   ;;  %vm494_vm6 = vcmask 523264  }
  0x21   :  { %86 = vmatpush1.bf16.msra.mxu0 %v1307_v7  ;;  %1202 = vmatprep.subr.bf16.mxu1 %v1406_v26  ;;  %v1542_v50 = vsel %vm263_vm3, %v40_v49, 0  ;;  %160 = vst.msk [vmem:[#allocation3] sm:$0xff] %vm79_vm1, %v159_v51  ;;  %vm1080_vm7 = vcmask 516096   ;;  %vm1090_vm9 = vcmask 0  }
  0x22   :  { %s1118_s10 = sshll.u32 %s1117_s9, 1  ;;  %1208 = vmatprep.subr.bf16.mxu0 %v1406_v26 }
  0x23   :  { %s1112_s13 = scalar_lea.vmem %s1741_s1, %s1118_s10 }
  0x24   :  { %v1467_v8 = vld [vmem:[%s1112_s13 + $0x40] sm:$0x1]  ;;  %v1476_v17 = vld [vmem:[%s1112_s13 + $0x41] sm:$0x1]  ;;  %1203 = vmatpush3.bf16.msra.mxu1 %v1505_v30 }
  0x25   :  { %1214 = vmatprep.subr.bf16.mxu1 %v1406_v26 }
  0x26   :  { %v162_v28 = vld [vmem:[#allocation2] sm:$0xff] }
  0x27   :  { %644 = vst.msk [vmem:[#allocation2] sm:$0xff] %vm79_vm1, %v643_v27 }
  0x28   :  { %v164_v27 = vld [vmem:[#allocation3] sm:$0xff] }
  0x30   :  { %136 = vrot.lane.b32.xlu0 %v1467_v8, %s1404_s14 }
  0xa7   :  { %v47_v9 = vpop.xlane.xlu0 %46 }
  0xa8   :  { %v49_v10 = vmul.f32 0.03125, %v47_v9 }
  0xaa   :  { %v50_v11 = vadd.f32 1e-05, %v49_v10 }
  0xab   :  { %v1491_v25 = vpop.permute.xlu0 %136 }
  0xac   :  { %1334 = vrsqrt.f32 %v50_v11 }
  0xb6   :  { %v1335_v12 = vpop.eup %1334 }
  0xb7   :  { %v52_v14 = vmul.f32 %v1335_v12, %v1446_v0 }
  0xb9   :  { %v53_v15 = vmul.f32 %v52_v14, %v41_v13 }
  0xbb   :  { %v54_v16 = vpack.c.bf16 %v53_v15, %v53_v15 }
  0xbd   :  { %1126 = vmatmul.mubr.msk.bf16.vlgmr.msra.gmra.mrb[0].mxu0 %vm79_vm1, %v54_v16 }
  0xbe   :  { %1210 = vmatprep.mubr.msk.bf16.mxu0 %vm1407_vm2, %v1406_v26  ;;  %1209 = vmatpush3.bf16.msra.mxu0 %v1542_v50 }
  0xbf   :  { %1222 = vmatprep.subr.bf16.mxu0 %v1406_v26 }
 0x190   :  { %v117_v18 = vpop.f32.mrb[0].mxu0 }
 0x191   :  { %v119_v19 = vpop.f32.mrb[1].mxu0  ;;  %v139_v29 = vmul.f32 %v1491_v25, %v117_v18  ;;  %v124_v38 = vmul.f32 %v1467_v8, %v117_v18 }
 0x192   :  { %v140_v20 = vmul.f32 %v1476_v17, %v119_v19  ;;  %v121_v21 = vpop.f32.mrb[2].mxu0 }
 0x193   :  { %v122_v22 = vpop.f32.mrb[3].mxu0 }
 0x194   :  { %142 = vrot.lane.b32.xlu1 %v140_v20, %s1404_s14 }
 0x198   :  { %126 = vrot.lane.b32.xlu1 %v1476_v17, %s1405_s17 }
 0x206   :  { %v143_v31 = vpop.permute.xlu1 %142 }
 0x207   :  { %v145_v32 = vadd.f32 %v143_v31, %v139_v29  ;;  %v1310_v29 = vld [vmem:[%s1742_s2 + $0x20] ss:$8 sps:$4 sm:$0xff]   ;;  %v1311_v31 = vld [vmem:[%s1742_s2 + $0x30] ss:$8 sps:$4 sm:$0xff]  }
 0x209   :  { %147 = vrot.lane.b32.xlu1 %v145_v32, %s1405_s17 }
 0x20a   :  { %v1512_v33 = vpop.permute.xlu1 %126 }
 0x20b   :  { %v129_v34 = vmul.f32 %v1512_v33, %v117_v18 }
 0x20d   :  { %131 = vrot.lane.b32.xlu1 %v129_v34, %s1404_s14 }
 0x211   :  { %152 = vrot.lane.b32.xlu1 %v117_v18, %s1408_s26 }
 0x27b   :  { %v148_v36 = vpop.permute.xlu1 %147 }
 0x27c   :  { %150 = vst.msk [vmem:[%s1745_s5] sm:$0x1] %vm44_vm0, %v148_v36  ;;  %158 = vst.msk [vmem:[#allocation2 + $0x8] sm:$0x1] %vm44_vm0, %v148_v36 }
 0x27f   :  { %v132_v39 = vpop.permute.xlu1 %131 }
 0x280   :  { %v134_v41 = vadd.f32 %v132_v39, %v124_v38 }
 0x282   :  { %v166_v42 = vmul.f32 0.35355338, %v134_v41 }
 0x283   :  { %v153_v43 = vpop.permute.xlu1 %152  ;;  %v163_v45 = vld [vmem:[#allocation2 + $0x8] sm:$0x1] }
 0x284   :  { %v170_v44 = vrot.slane %v166_v42, %v169_v40  ;;  %155 = vst.msk [vmem:[%s1745_s5 + $0x1] sm:$0x1] %vm44_vm0, %v153_v43  ;;  %161 = vst.msk [vmem:[#allocation3 + $0x8] sm:$0x1] %vm44_vm0, %v153_v43 }
 0x286   :  { %v171_v46 = vmul.f32 %v170_v44, %v162_v28  ;;  %v172_v47 = vmul.f32 %v170_v44, %v163_v45  ;;  %v646_v28 = vld [vmem:[%s1743_s3 + $0x18] sm:$0xff] }
 0x287   :  { %647 = vst.msk [vmem:[#allocation3] sm:$0xff] %vm79_vm1, %v646_v28 }
 0x288   :  { %v173_v48 = vpack.c.bf16 %v172_v47, %v171_v46 }
 0x28a   :  { %1205 = vmatmul.mubr.msk.bf16.vlgmr.msra.gmra.mrb[0].mxu1 %vm79_vm1, %v173_v48 }
 0x28b   :  { %1218 = vmatprep.mubr.msk.bf16.mxu1 %vm1407_vm2, %v1406_v26  ;;  %1215 = vmatpush3.bf16.msra.mxu1 %v1310_v29  ;;  %v165_v38 = vld [vmem:[#allocation3 + $0x8] sm:$0x1] }
 0x28c   :  { %1216 = vmatprep.subr.bf16.mxu1 %v1406_v26 }
 0x28f   :  { %1217 = vmatpush3.bf16.msra.mxu1 %v1311_v31 }
 0x290   :  { %1230 = vmatprep.subr.bf16.mxu1 %v1406_v26 }
 0x35d   :  { %v223_v52 = vpop.f32.mrb[0].mxu1 }
 0x35e   :  { %v1206_v53 = vpop.f32.mrb[1].mxu1  ;;  %v231_v55 = vsel %vm230_vm4, %v223_v52, -inf }
 0x35f   :  { %v226_v54 = vpop.f32.mrb[2].mxu1 }
 0x360   :  { %v233_v56 = vsel %vm232_vm5, %v226_v54, -inf  ;;  %v1207_v57 = vpop.f32.mrb[3].mxu1 }
 0x361   :  { %v234_v58 = vmax.f32 %v231_v55, %v233_v56 }
 0x363   :  { %v235_v59 = vrot.slane %v234_v58, 4 }
 0x365   :  { %v236_v60 = vmax.f32 %v234_v58, %v235_v59 }
 0x367   :  { %v237_v61 = vrot.slane %v236_v60, 2 }
 0x369   :  { %v238_v62 = vmax.f32 %v236_v60, %v237_v61  ;;  %v1312_v61 = vld [vmem:[%s1742_s2 + $0x40] ss:$8 sps:$4 sm:$0xff]  }
 0x36b   :  { %v239_v63 = vrot.slane %v238_v62, 1 }
 0x36d   :  { %v240_v1 = vmax.f32 %v238_v62, %v239_v63  ;;  %v1313_v62 = vld [vmem:[%s1742_s2 + $0x50] ss:$8 sps:$4 sm:$0xff]  }
 0x36f   :  { %v241_v2 = vsub.f32 %v223_v52, %v240_v1  ;;  %v242_v3 = vsub.f32 %v226_v54, %v240_v1 }
 0x371   :  { %v243_v4 = vmul.f32 1.442695, %v241_v2  ;;  %v245_v5 = vmul.f32 1.442695, %v242_v3  ;;  %v42_v3 = vld [vmem:[%s1741_s1 + $0x81] sm:$0x1] }
 0x373   :  { %1336 = vpow2.f32 %v243_v4 }
 0x374   :  { %1338 = vpow2.f32 %v245_v5 }
 0x37d   :  { %v1337_v7 = vpop.eup %1336 }
 0x37e   :  { %v1339_v9 = vpop.eup %1338  ;;  %v247_v10 = vsel %vm230_vm4, %v1337_v7, 0.0 }
 0x37f   :  { %v248_v11 = vsel %vm232_vm5, %v1339_v9, 0.0 }
 0x380   :  { %v249_v12 = vadd.f32 %v248_v11, %v247_v10  ;;  %v1315_v10 = vld [vmem:[%s1742_s2 + $0x70] ss:$8 sps:$4 sm:$0xff]   ;;  %v1316_v11 = vld [vmem:[%s1742_s2 + $0x80] ss:$8 sps:$4 sm:$0xff]  }
 0x382   :  { %v250_v13 = vrot.slane %v249_v12, 4 }
 0x384   :  { %v251_v14 = vadd.f32 %v250_v13, %v249_v12 }
 0x386   :  { %v252_v15 = vrot.slane %v251_v14, 2 }
 0x388   :  { %v253_v16 = vadd.f32 %v252_v15, %v251_v14 }
 0x38a   :  { %v254_v18 = vrot.slane %v253_v16, 1 }
 0x38c   :  { %v255_v19 = vadd.f32 %v254_v18, %v253_v16 }
 0x38e   :  { %1340 = vrcp.f32 %v255_v19 }
 0x398   :  { %v1341_v20 = vpop.eup %1340 }
 0x399   :  { %v258_v21 = vmul.f32 %v1341_v20, %v1339_v9  ;;  %v257_v22 = vmul.f32 %v1341_v20, %v1337_v7  ;;  %v1314_v9 = vld [vmem:[%s1742_s2 + $0x60] ss:$8 sps:$4 sm:$0xff]  }
 0x39b   :  { %v259_v23 = vpack.c.bf16 %v258_v21, %v257_v22 }
 0x39d   :  { %1211 = vmatmul.mubr.msk.bf16.vlgmr.msra.gmra.mrb[4].mxu0 %vm230_vm4, %v259_v23 }
 0x39e   :  { %1226 = vmatprep.mubr.msk.bf16.mxu0 %vm1407_vm2, %v1406_v26  ;;  %1223 = vmatpush3.bf16.msra.mxu0 %v1312_v61 }
 0x39f   :  { %1224 = vmatprep.subr.bf16.mxu0 %v1406_v26 }
 0x3a2   :  { %1225 = vmatpush3.bf16.msra.mxu0 %v1313_v62 }
 0x470   :  { %v301_v32 = vpop.f32.mrb[4].mxu0 }
 0x471   :  { %v308_v34 = vmul.f32 %v301_v32, %v164_v27  ;;  %v1212_v36 = vpop.f32.mrb[5].mxu0 }
 0x472   :  { %v304_v39 = vpop.f32.mrb[6].mxu0 }
 0x473   :  { %v309_v41 = vmul.f32 %v304_v39, %v165_v38  ;;  %v1213_v42 = vpop.f32.mrb[7].mxu0  ;;  %v310_v43 = vsel %vm79_vm1, %v308_v34, 0.0  ;;  %v1318_v39 = vld [vmem:[%s1742_s2 + $0xa0] ss:$8 sps:$4 sm:$0xff]  }
 0x474   :  { %v1323_v42 = vld [vmem:[%s1742_s2 + $0xb4] ss:$8 sps:$4 sm:$0xff]  }
 0x475   :  { %v311_v44 = vsel %vm44_vm0, %v309_v41, 0.0  ;;  %v1321_v41 = vld [vmem:[%s1742_s2 + $0xb0] ss:$8 sps:$4 sm:$0xff]  }
 0x476   :  { %v312_v45 = vadd.f32 %v311_v44, %v310_v43 }
 0x478   :  { %v313_v46 = vrot.slane %v312_v45, 4 }
 0x47a   :  { %v314_v47 = vadd.f32 %v313_v46, %v312_v45 }
 0x47c   :  { %v315_v48 = vrot.slane %v314_v47, 2 }
 0x47e   :  { %v316_v49 = vadd.f32 %v315_v48, %v314_v47  ;;  %v539_v47 = vld [vmem:[%s1741_s1 + $0x82] sm:$0x1] }
 0x480   :  { %v317_v51 = vrot.slane %v316_v49, 1 }
 0x482   :  { %v318_v52 = vadd.f32 %v317_v51, %v316_v49 }
 0x484   :  { %v319_v53 = vpack.c.bf16 %v318_v52, %v318_v52 }
 0x486   :  { %1219 = vmatmul.mubr.msk.bf16.vlgmr.msra.gmra.mrb[4].mxu1 %vm79_vm1, %v319_v53 }
 0x487   :  { %1238 = vmatprep.mubr.msk.bf16.mxu1 %vm1407_vm2, %v1406_v26  ;;  %1231 = vmatpush3.bf16.msra.mxu1 %v1314_v9 }
 0x488   :  { %1232 = vmatprep.subr.bf16.mxu1 %v1406_v26 }
 0x48b   :  { %1233 = vmatpush3.bf16.msra.mxu1 %v1315_v10 }
 0x48c   :  { %1234 = vmatprep.subr.bf16.mxu1 %v1406_v26 }
 0x48f   :  { %1235 = vmatpush3.bf16.msra.mxu1 %v1316_v11 }
 0x490   :  { %1236 = vmatprep.subr.bf16.mxu1 %v1406_v26 }
 0x559   :  { %v373_v54 = vpop.f32.mrb[4].mxu1 }
 0x55a   :  { %v379_v55 = vadd.f32 %v373_v54, %v1446_v0  ;;  %v1220_v56 = vpop.f32.mrb[5].mxu1 }
 0x55b   :  { %v376_v57 = vpop.f32.mrb[6].mxu1 }
 0x55c   :  { %v1221_v58 = vpop.f32.mrb[7].mxu1  ;;  %v380_v59 = vmul.f32 %v379_v55, %v379_v55 }
 0x55e   :  { %v381_v60 = vsel %vm44_vm0, %v380_v59, 0.0 }
 0x55f   :  { %382 = vadd.xlane.f32.xlu1 %v381_v60 }
 0x5ec   :  { %v383_v0 = vpop.xlane.xlu1 %382 }
 0x5ed   :  { %v384_v63 = vmul.f32 0.03125, %v383_v0 }
 0x5ef   :  { %v385_v1 = vadd.f32 1e-05, %v384_v63 }
 0x5f1   :  { %1342 = vrsqrt.f32 %v385_v1 }
 0x5fb   :  { %v1343_v2 = vpop.eup %1342 }
 0x5fc   :  { %v387_v4 = vmul.f32 %v1343_v2, %v379_v55 }
 0x5fe   :  { %v388_v5 = vmul.f32 %v387_v4, %v42_v3 }
 0x600   :  { %v389_v7 = vpack.c.bf16 %v388_v5, %v388_v5 }
 0x602   :  { %1227 = vmatmul.mubr.msk.bf16.vlgmr.msra.gmra.mrb[8].mxu0 %vm79_vm1, %v389_v7 }
 0x603   :  { %610 = vmatprep.mubr.bf16.mxu0 %v1403_v6  ;;  %v1317_v6 = vld [vmem:[%s1742_s2 + $0x90] ss:$8 sps:$4 sm:$0xff]  }
 0x604   :  { %1237 = vmatpush3.bf16.msra.mxu1 %v1317_v6 }
 0x605   :  { %1250 = vmatprep.subr.bf16.mxu1 %v1406_v26 }
 0x6d5   :  { %v443_v12 = vpop.f32.mrb[8].mxu0 }
 0x6d6   :  { %457 = vrot.lane.b32.xlu0 %v443_v12, %s1408_s26  ;;  %v1228_v13 = vpop.f32.mrb[9].mxu0  ;;  %v1137_v16 = vmul.f32 -1.442695, %v443_v12 }
 0x6d7   :  { %v446_v14 = vpop.f32.mrb[10].mxu0 }
 0x6d8   :  { %v1229_v15 = vpop.f32.mrb[11].mxu0  ;;  %1344 = vpow2.f32 %v1137_v16 }
 0x6e2   :  { %v1345_v18 = vpop.eup %1344 }
 0x6e3   :  { %v452_v19 = vadd.f32 1.0, %v1345_v18 }
 0x6e5   :  { %1346 = vrcp.f32 %v452_v19 }
 0x6ef   :  { %v1347_v20 = vpop.eup %1346 }
 0x6f0   :  { %v455_v21 = vmul.f32 %v1347_v20, %v443_v12 }
 0x748   :  { %v458_v22 = vpop.permute.xlu0 %457 }
 0x749   :  { %v460_v23 = vmul.f32 %v458_v22, %v455_v21 }
 0x74b   :  { %v461_v27 = vpack.c.bf16 %v460_v23, %v460_v23 }
 0x74d   :  { %1239 = vmatmul.mubr.msk.bf16.vlgmr.msra.gmra.mrb[8].mxu1 %vm494_vm6, %v461_v27 }
 0x74e   :  { %1251 = vmatpush3.bf16.msra.mxu1 %v1542_v50  ;;  %1252 = vmatprep.mubr.msk.bf16.mxu1 %vm1407_vm2, %v1406_v26  ;;  %v1320_v50 = vld [vmem:[%s1742_s2 + $0xa4] ss:$8 sps:$4 sm:$0xff]  }
 0x74f   :  { %1264 = vmatprep.subr.bf16.mxu1 %v1406_v26  ;;  %578 = vmatprep.subr.bf16.mxu0 %v1320_v50 }
 0x750   :  { %579 = vmatpush1.bf16.msra.mxu0 %v1318_v39 }
 0x751   :  { %580 = vmatprep.subr.bf16.mxu0 %v1323_v42 }
 0x754   :  { %581 = vmatpush1.bf16.msra.mxu0 %v1321_v41 }
 0x755   :  { %1242 = vmatprep.subr.bf16.mxu0 %v1406_v26 }
 0x820   :  { %v532_v28 = vpop.f32.mrb[8].mxu1 }
 0x821   :  { %v1610_v29 = vadd.f32 %v532_v28, %v379_v55  ;;  %v1240_v31 = vpop.f32.mrb[9].mxu1 }
 0x822   :  { %v535_v32 = vpop.f32.mrb[10].mxu1 }
 0x823   :  { %v1241_v34 = vpop.f32.mrb[11].mxu1  ;;  %v541_v36 = vmul.f32 %v1610_v29, %v1610_v29 }
 0x825   :  { %v542_v38 = vsel %vm44_vm0, %v541_v36, 0.0 }
 0x826   :  { %543 = vadd.xlane.f32.xlu0 %v542_v38 }
 0x8b3   :  { %v544_v43 = vpop.xlane.xlu0 %543 }
 0x8b4   :  { %v545_v44 = vmul.f32 0.03125, %v544_v43  ;;  %v1324_v43 = vld [vmem:[%s1742_s2 + $0xc0] ss:$8 sps:$4 sm:$0xff]  }
 0x8b6   :  { %v546_v45 = vadd.f32 1e-05, %v545_v44  ;;  %v1325_v44 = vld [vmem:[%s1742_s2 + $0xd0] ss:$8 sps:$4 sm:$0xff]  }
 0x8b8   :  { %1348 = vrsqrt.f32 %v546_v45  ;;  %v651_v45 = vld [vmem:[#allocation3] sm:$0xff] }
 0x8c2   :  { %v1349_v46 = vpop.eup %1348 }
 0x8c3   :  { %v548_v48 = vmul.f32 %v1349_v46, %v1610_v29 }
 0x8c5   :  { %v549_v49 = vmul.f32 %v548_v48, %v539_v47 }
 0x8c7   :  { %v550_v51 = vpack.c.bf16 %v549_v49, %v549_v49 }
 0x8c9   :  { %1147 = vmatmul.mubr.msk.bf16.vlgmr.msra.gmra.mrb[12].mxu0 %vm79_vm1, %v550_v51 }
 0x8ca   :  { %1243 = vmatpush3.bf16.msra.mxu0 %v1489_v24  ;;  %1246 = vmatprep.mubr.msk.bf16.mxu0 %vm1407_vm2, %v1406_v26 }
 0x8cb   :  { %1244 = vmatprep.subr.bf16.mxu0 %v1406_v26 }
 0x8ce   :  { %1245 = vmatpush3.bf16.msra.mxu0 %v1505_v30 }
 0x8cf   :  { %1256 = vmatprep.subr.bf16.mxu0 %v1406_v26 }
 0x99c   :  { %v612_v52 = vpop.f32.mrb[12].mxu0 }
 0x99d   :  { %v614_v53 = vpop.f32.mrb[13].mxu0  ;;  %v620_v57 = vmul.f32 %v612_v52, %v1512_v33  ;;  %v626_v24 = vmul.f32 %v612_v52, %v1491_v25  ;;  %v619_v59 = vmul.f32 %v1467_v8, %v612_v52  ;;  %v649_v25 = vld [vmem:[#allocation2] sm:$0xff] }
 0x99e   :  { %v627_v54 = vmul.f32 %v1476_v17, %v614_v53  ;;  %v616_v55 = vpop.f32.mrb[14].mxu0 }
 0x99f   :  { %v617_v56 = vpop.f32.mrb[15].mxu0 }
 0x9a0   :  { %629 = vrot.lane.b32.xlu1 %v627_v54, %s1404_s14 }
 0x9a4   :  { %622 = vrot.lane.b32.xlu1 %v620_v57, %s1404_s14 }
 0x9a8   :  { %639 = vrot.lane.b32.xlu1 %v612_v52, %s1408_s26 }
 0xa12   :  { %v630_v58 = vpop.permute.xlu1 %629 }
 0xa13   :  { %v632_v30 = vadd.f32 %v630_v58, %v626_v24 }
 0xa15   :  { %634 = vrot.lane.b32.xlu0 %v632_v30, %s1405_s17 }
 0xa16   :  { %v623_v60 = vpop.permute.xlu1 %622 }
 0xa17   :  { %v625_v17 = vadd.f32 %v623_v60, %v619_v59 }
 0xa19   :  { %v653_v62 = vmul.f32 0.35355338, %v625_v17 }
 0xa1a   :  { %v640_v61 = vpop.permute.xlu1 %639 }
 0xa1b   :  { %642 = vst.msk [vmem:[%s1745_s5 + $0x3] sm:$0x1] %vm44_vm0, %v640_v61  ;;  %648 = vst.msk [vmem:[#allocation3 + $0x8] sm:$0x1] %vm44_vm0, %v640_v61  ;;  %v657_v8 = vrot.slane %v653_v62, %v169_v40 }
 0xa1d   :  { %v658_v63 = vmul.f32 %v657_v8, %v649_v25 }
 0xa22   :  { %v652_v49 = vld [vmem:[#allocation3 + $0x8] sm:$0x1] }
 0xa87   :  { %v635_v33 = vpop.permute.xlu0 %634 }
 0xa88   :  { %637 = vst.msk [vmem:[%s1745_s5 + $0x2] sm:$0x1] %vm44_vm0, %v635_v33  ;;  %645 = vst.msk [vmem:[#allocation2 + $0x8] sm:$0x1] %vm44_vm0, %v635_v33 }
 0xa8f   :  { %v650_v0 = vld [vmem:[#allocation2 + $0x8] sm:$0x1] }
 0xa90   :  { %v659_v1 = vmul.f32 %v657_v8, %v650_v0 }
 0xa92   :  { %v660_v2 = vpack.c.bf16 %v659_v1, %v658_v63  ;;  %v1326_v1 = vld [vmem:[%s1742_s2 + $0xe0] ss:$8 sps:$4 sm:$0xff]  }
 0xa94   :  { %1247 = vmatmul.mubr.msk.bf16.vlgmr.msra.gmra.mrb[16].mxu0 %vm79_vm1, %v660_v2  ;;  %v1327_v2 = vld [vmem:[%s1742_s2 + $0xf0] ss:$8 sps:$4 sm:$0xff]  }
 0xa95   :  { %1260 = vmatprep.mubr.msk.bf16.mxu0 %vm1407_vm2, %v1406_v26  ;;  %1257 = vmatpush3.bf16.msra.mxu0 %v1324_v43 }
 0xa96   :  { %1258 = vmatprep.subr.bf16.mxu0 %v1406_v26 }
 0xa99   :  { %1259 = vmatpush3.bf16.msra.mxu0 %v1325_v44 }
 0xa9a   :  { %1272 = vmatprep.subr.bf16.mxu0 %v1406_v26 }
 0xb67   :  { %v698_v3 = vpop.f32.mrb[16].mxu0 }
 0xb68   :  { %v1248_v4 = vpop.f32.mrb[17].mxu0  ;;  %v705_v7 = vsel %vm230_vm4, %v698_v3, -inf }
 0xb69   :  { %v701_v5 = vpop.f32.mrb[18].mxu0 }
 0xb6a   :  { %v706_v9 = vsel %vm232_vm5, %v701_v5, -inf  ;;  %v1249_v10 = vpop.f32.mrb[19].mxu0 }
 0xb6b   :  { %v707_v37 = vmax.f32 %v705_v7, %v706_v9  ;;  %v540_v7 = vld [vmem:[%s1741_s1 + $0x83] sm:$0x1] }
 0xb6d   :  { %v708_v40 = vrot.slane %v707_v37, 4 }
 0xb6f   :  { %v709_v11 = vmax.f32 %v707_v37, %v708_v40  ;;  %v1328_v40 = vld [vmem:[%s1742_s2 + $0x100] ss:$8 sps:$4 sm:$0xff]  }
 0xb71   :  { %v710_v6 = vrot.slane %v709_v11, 2 }
 0xb73   :  { %v711_v12 = vmax.f32 %v709_v11, %v710_v6  ;;  %v1329_v11 = vld [vmem:[%s1742_s2 + $0x110] ss:$8 sps:$4 sm:$0xff]   ;;  %v1330_v6 = vld [vmem:[%s1742_s2 + $0x120] ss:$8 sps:$4 sm:$0xff]  }
 0xb75   :  { %v712_v13 = vrot.slane %v711_v12, 1 }
 0xb77   :  { %v713_v14 = vmax.f32 %v711_v12, %v712_v13  ;;  %v1331_v12 = vld [vmem:[%s1742_s2 + $0x130] ss:$8 sps:$4 sm:$0xff]  }
 0xb79   :  { %v714_v15 = vsub.f32 %v698_v3, %v713_v14  ;;  %v715_v16 = vsub.f32 %v701_v5, %v713_v14 }
 0xb7b   :  { %v716_v18 = vmul.f32 1.442695, %v714_v15  ;;  %v718_v19 = vmul.f32 1.442695, %v715_v16 }
 0xb7d   :  { %1350 = vpow2.f32 %v716_v18 }
 0xb7e   :  { %1352 = vpow2.f32 %v718_v19 }
 0xb87   :  { %v1351_v20 = vpop.eup %1350 }
 0xb88   :  { %v1353_v21 = vpop.eup %1352  ;;  %v720_v22 = vsel %vm230_vm4, %v1351_v20, 0.0 }
 0xb89   :  { %v721_v23 = vsel %vm232_vm5, %v1353_v21, 0.0 }
 0xb8a   :  { %v722_v27 = vadd.f32 %v721_v23, %v720_v22 }
 0xb8c   :  { %v723_v28 = vrot.slane %v722_v27, 4 }
 0xb8e   :  { %v724_v31 = vadd.f32 %v723_v28, %v722_v27 }
 0xb90   :  { %v725_v32 = vrot.slane %v724_v31, 2 }
 0xb92   :  { %v726_v34 = vadd.f32 %v725_v32, %v724_v31 }
 0xb94   :  { %v727_v36 = vrot.slane %v726_v34, 1 }
 0xb96   :  { %v728_v38 = vadd.f32 %v727_v36, %v726_v34 }
 0xb98   :  { %1354 = vrcp.f32 %v728_v38 }
 0xba2   :  { %v1355_v50 = vpop.eup %1354 }
 0xba3   :  { %v731_v39 = vmul.f32 %v1355_v50, %v1353_v21  ;;  %v730_v41 = vmul.f32 %v1355_v50, %v1351_v20 }
 0xba5   :  { %v732_v42 = vpack.c.bf16 %v731_v39, %v730_v41  ;;  %v1332_v41 = vld [vmem:[%s1742_s2 + $0x140] ss:$8 sps:$4 sm:$0xff]  }
 0xba7   :  { %1253 = vmatmul.mubr.msk.bf16.vlgmr.msra.gmra.mrb[12].mxu1 %vm230_vm4, %v732_v42  ;;  %v1333_v42 = vld [vmem:[%s1742_s2 + $0x150] ss:$8 sps:$4 sm:$0xff]  }
 0xba8   :  { %1268 = vmatprep.mubr.msk.bf16.mxu1 %vm1407_vm2, %v1406_v26  ;;  %1265 = vmatpush3.bf16.msra.mxu1 %v1326_v1 }
 0xba9   :  { %1266 = vmatprep.subr.bf16.mxu1 %v1406_v26 }
 0xbac   :  { %1267 = vmatpush3.bf16.msra.mxu1 %v1327_v2 }
 0xbad   :  { %1284 = vmatprep.subr.bf16.mxu1 %v1406_v26 }
 0xc7a   :  { %v770_v46 = vpop.f32.mrb[12].mxu1 }
 0xc7b   :  { %v777_v47 = vmul.f32 %v770_v46, %v651_v45  ;;  %v1254_v48 = vpop.f32.mrb[13].mxu1 }
 0xc7c   :  { %v773_v51 = vpop.f32.mrb[14].mxu1 }
 0xc7d   :  { %v778_v52 = vmul.f32 %v773_v51, %v652_v49  ;;  %v1255_v53 = vpop.f32.mrb[15].mxu1  ;;  %v779_v54 = vsel %vm79_vm1, %v777_v47, 0.0  ;;  %v1007_v47 = vld [vmem:[%s1741_s1 + $0x84] sm:$0x1]  ;;  %s1409_s1 = smov [#allocation6]  }
 0xc7e   :  { %s1098_s2 = sshll.u32 %s1409_s1, 4  ;;  %s1099_s2 = int_to_ptr.vmem [resolvable:$true] %s1098_s2 }
 0xc7f   :  { %v780_v55 = vsel %vm44_vm0, %v778_v52, 0.0  ;;  %s1376_s3 = scalar_lea.vmem %s1099_s2, 16  ;;  %s1380_s16 = scalar_lea.vmem %s1099_s2, 32 }
 0xc80   :  { %v781_v56 = vadd.f32 %v780_v55, %v779_v54  ;;  %p1377_p5 = scmp.ne.s32.totalorder %s1099_s2, %s1376_s3  ;;  %p1381_p6 = scmp.lt.s32.totalorder %s1099_s2, %s1099_s2 }
 0xc81   :  { %p1382_p7 = scmp.lt.s32.totalorder %s1380_s16, %s1376_s3 }
 0xc82   :  { %v782_v57 = vrot.slane %v781_v56, 4 }
 0xc83   :  { %p1383_p8 = por %p1382_p7, %p1381_p6 }
 0xc84   :  { %v783_v24 = vadd.f32 %v782_v57, %v781_v56  ;;  %v1078_v56 = vand.u32 127, %v167_v35 }
 0xc85   :  { %p1384_p9 = pnand %p1383_p8, %p1377_p5 }
 0xc86   :  { %v784_v58 = vrot.slane %v783_v24, 2  ;;  %v1079_v57 = vcvt.s32.f32 %v1078_v56 }
 0xc88   :  { %v785_v30 = vadd.f32 %v784_v58, %v783_v24 }
 0xc8a   :  { %v786_v59 = vrot.slane %v785_v30, 1 }
 0xc8c   :  { %v787_v60 = vadd.f32 %v786_v59, %v785_v30 }
 0xc8e   :  { %v788_v17 = vpack.c.bf16 %v787_v60, %v787_v60 }
 0xc90   :  { %1261 = vmatmul.mubr.msk.bf16.vlgmr.msra.gmra.mrb[20].mxu0 %vm79_vm1, %v788_v17 }
 0xc91   :  { %1280 = vmatprep.mubr.msk.bf16.mxu0 %vm1407_vm2, %v1406_v26  ;;  %1273 = vmatpush3.bf16.msra.mxu0 %v1328_v40 }
 0xc92   :  { %1274 = vmatprep.subr.bf16.mxu0 %v1406_v26 }
 0xc95   :  { %1275 = vmatpush3.bf16.msra.mxu0 %v1329_v11 }
 0xc96   :  { %1276 = vmatprep.subr.bf16.mxu0 %v1406_v26 }
 0xc99   :  { %1277 = vmatpush3.bf16.msra.mxu0 %v1330_v6 }
 0xc9a   :  { %1278 = vmatprep.subr.bf16.mxu0 %v1406_v26 }
 0xc9d   :  { %1279 = vmatpush3.bf16.msra.mxu0 %v1331_v12 }
 0xd63   :  { %v842_v61 = vpop.f32.mrb[20].mxu0 }
 0xd64   :  { %v848_v33 = vadd.f32 %v842_v61, %v1610_v29  ;;  %v1262_v62 = vpop.f32.mrb[21].mxu0 }
 0xd65   :  { %v845_v8 = vpop.f32.mrb[22].mxu0 }
 0xd66   :  { %v1263_v25 = vpop.f32.mrb[23].mxu0  ;;  %v849_v0 = vmul.f32 %v848_v33, %v848_v33 }
 0xd68   :  { %v850_v63 = vsel %vm44_vm0, %v849_v0, 0.0 }
 0xd69   :  { %851 = vadd.xlane.f32.xlu1 %v850_v63 }
 0xdf6   :  { %v852_v29 = vpop.xlane.xlu1 %851 }
 0xdf7   :  { %v853_v3 = vmul.f32 0.03125, %v852_v29 }
 0xdf9   :  { %v854_v4 = vadd.f32 1e-05, %v853_v3 }
 0xdfb   :  { %1356 = vrsqrt.f32 %v854_v4 }
 0xe05   :  { %v1357_v5 = vpop.eup %1356 }
 0xe06   :  { %v856_v9 = vmul.f32 %v1357_v5, %v848_v33 }
 0xe08   :  { %v857_v10 = vmul.f32 %v856_v9, %v540_v7 }
 0xe0a   :  { %v858_v37 = vpack.c.bf16 %v857_v10, %v857_v10 }
 0xe0c   :  { %1269 = vmatmul.mubr.msk.bf16.vlgmr.msra.gmra.mrb[16].mxu1 %vm79_vm1, %v858_v37 }
 0xe0d   :  { %1288 = vmatprep.mubr.msk.bf16.mxu1 %vm1407_vm2, %v1406_v26  ;;  %1285 = vmatpush3.bf16.msra.mxu1 %v1332_v41 }
 0xe0e   :  { %1286 = vmatprep.subr.bf16.mxu1 %v1406_v26 }
 0xe11   :  { %1287 = vmatpush3.bf16.msra.mxu1 %v1333_v42 }
 0xedf   :  { %v912_v13 = vpop.f32.mrb[16].mxu1 }
 0xee0   :  { %926 = vrot.lane.b32.xlu0 %v912_v13, %s1408_s26  ;;  %v1270_v14 = vpop.f32.mrb[17].mxu1  ;;  %v1156_v18 = vmul.f32 -1.442695, %v912_v13 }
 0xee1   :  { %v915_v15 = vpop.f32.mrb[18].mxu1 }
 0xee2   :  { %v1271_v16 = vpop.f32.mrb[19].mxu1  ;;  %1358 = vpow2.f32 %v1156_v18 }
 0xeec   :  { %v1359_v19 = vpop.eup %1358 }
 0xeed   :  { %v921_v20 = vadd.f32 1.0, %v1359_v19 }
 0xeef   :  { %1360 = vrcp.f32 %v921_v20 }
 0xef9   :  { %v1361_v21 = vpop.eup %1360 }
 0xefa   :  { %v924_v22 = vmul.f32 %v1361_v21, %v912_v13 }
 0xf52   :  { %v927_v23 = vpop.permute.xlu0 %926 }
 0xf53   :  { %v929_v27 = vmul.f32 %v927_v23, %v924_v22 }
 0xf55   :  { %v930_v28 = vpack.c.bf16 %v929_v27, %v929_v27 }
 0xf57   :  { %1281 = vmatmul.mubr.msk.bf16.vlgmr.msra.gmra.mrb[24].mxu0 %vm494_vm6, %v930_v28 }
0x102a   :  { %v1000_v31 = vpop.f32.mrb[24].mxu0 }
0x102b   :  { %v1006_v32 = vadd.f32 %v1000_v31, %v848_v33  ;;  %v1282_v34 = vpop.f32.mrb[25].mxu0 }
0x102c   :  { %v1003_v36 = vpop.f32.mrb[26].mxu0 }
0x102d   :  { %v1283_v38 = vpop.f32.mrb[27].mxu0  ;;  %v1008_v50 = vmul.f32 %v1006_v32, %v1006_v32 }
0x102f   :  { %v1009_v39 = vsel %vm44_vm0, %v1008_v50, 0.0 }
0x1030   :  { %1010 = vadd.xlane.f32.xlu0 %v1009_v39 }
0x10bd   :  { %v1011_v43 = vpop.xlane.xlu0 %1010 }
0x10be   :  { %v1012_v44 = vmul.f32 0.03125, %v1011_v43 }
0x10c0   :  { %v1013_v45 = vadd.f32 1e-05, %v1012_v44 }
0x10c2   :  { %1362 = vrsqrt.f32 %v1013_v45 }
0x10cc   :  { %v1363_v46 = vpop.eup %1362 }
0x10cd   :  { %v1015_v48 = vmul.f32 %v1363_v46, %v1006_v32 }
0x10cf   :  { %v1016_v49 = vmul.f32 %v1015_v48, %v1007_v47 }
0x10d1   :  { %v1017_v51 = vpack.c.bf16 %v1016_v49, %v1016_v49 }
0x10d3   :  { %1289 = vmatmul.mubr.msk.bf16.vlgmr.msra.gmra.mrb[20].mxu1 %vm79_vm1, %v1017_v51 }
0x11a6   :  { %v1071_v26 = vpop.f32.mrb[20].mxu1 }
0x11a7   :  { %v1290_v52 = vpop.f32.mrb[21].mxu1  ;;  %v1081_v53 = vsel %vm1080_vm7, %v1071_v26, -inf }
0x11a8   :  { %1082 = vmax.xlane.f32.xlu1 %v1081_v53  ;;  %v1074_v54 = vpop.f32.mrb[22].mxu1 }
0x11a9   :  { %v1291_v55 = vpop.f32.mrb[23].mxu1 }
0x1235   :  { %v1083_v24 = vpop.xlane.xlu1 %1082 }
0x1236   :  { %vm1084_vm8 = vcmp.ge.f32.partialorder %v1071_v26, %v1083_v24 }
0x1237   :  { %v1085_v58 = vsel %vm1084_vm8, %v1079_v57, 64.0 }
0x1238   :  { %v1086_v30 = vsel %vm1080_vm7, %v1085_v58, inf }
0x1239   :  { %1087 = vmin.xlane.f32.xlu0 %v1086_v30 }
0x12c6   :  { %v1088_v59 = vpop.xlane.xlu0 %1087 }
0x12c7   :  { %v1292_v60 = vtrunc.f32 %v1088_v59 }
0x12c9   :  { %v1293_v17 = vcvt.f32.s32 %v1292_v60 }
0x12cb   :  { %1091 = vst.msk [vmem:[#allocation6] sm:$0x1] %vm1090_vm9, %v1293_v17 }
0x12cc   :  { %1387 = shalt.err (!%p1384_p9)
}
0x12cd   :  { %s1388_s5 = scalar_lea.hbm %s1744_s4, 16 }
0x12ce   :  { %p1389_p10 = scmp.ne.s32.totalorder %s1744_s4, %s1388_s5  ;;  %p1392_p11 = scmp.lt.u32.totalorder %s1388_s5, %s1744_s4 }
0x12d0   :  { %p1394_p12 = pnand %p1392_p11, %p1389_p10 }
0x12d2   :  { %1397 = shalt.err (!%p1394_p12)
}
0x12d3   :  { %1101 = dma.vmem_to_hbm [thread:$0]  %s1099_s2, 16, %s1744_s4, [#allocation7]  }
0x12d4   :  { %1400 = dma.done.wait [#allocation7], 16  }
0x12d5   :  { %1401 = vsyncadd [#allocation7], 4294967280 }
0x12d6   :  { %1109 = vsyncpa [#allocation7], 1 }

</bundles_post_ra>
